<compile_context>
chip_gen: v7x
topology: tpu7x:2x2x1
jax: 0.10.0
libtpu: 0.0.40
codegen_flags: <defaults>
</compile_context>

<pallas_src>
import functools

import jax
import jax.numpy as jnp
from jax.experimental import pallas as pl
from jax.experimental.pallas import tpu as pltpu


def _mha_kernel(x_ref, wqkv_ref, wo_ref, bo_ref, o_ref, *, num_heads, head_dim):
    # x_ref: (Bb, T, d_in) block of batch elements.
    Bb, T, d_in = x_ref.shape
    H, hd = num_heads, head_dim
    d_out = H * hd
    op_dtype = wqkv_ref.dtype        # MXU operand dtype (f32 or bf16)

    # ---- Fused QKV projection: ONE MXU GEMM over every token in the block.
    x2 = x_ref[...].reshape(Bb * T, d_in)                      # leading merge: free
    qkv = jnp.dot(x2, wqkv_ref[...],
                  preferred_element_type=jnp.float32)          # (Bb*T, 3*d_out) f32
    # Single cast for the attention-matmul operands (no-op in the f32 path).
    qkv_ops = qkv.astype(op_dtype).reshape(Bb, T, 3 * d_out)   # leading split: free

    # ---- Causal additive bias, built once (f32; avoids -inf -> NaN rows).
    row = jax.lax.broadcasted_iota(jnp.int32, (T, T), 0)
    col = jax.lax.broadcasted_iota(jnp.int32, (T, T), 1)
    bias = jnp.where(col <= row, 0.0, -1e30).astype(jnp.float32)

    # ---- Attention: short loop over heads, vectorized over the batch block.
    # Head slabs are contiguous static lane slices of the GEMM output, so there
    # are no stack / transpose relayouts; softmax math stays f32 on all chips.
    ctx_heads = []
    for h in range(H):
        q_h = qkv_ops[:, :, 0 * d_out + h * hd: 0 * d_out + (h + 1) * hd]
        k_h = qkv_ops[:, :, 1 * d_out + h * hd: 1 * d_out + (h + 1) * hd]
        v_h = qkv_ops[:, :, 2 * d_out + h * hd: 2 * d_out + (h + 1) * hd]
        # (Bb, T, T) scores; q already carries 1/sqrt(hd) (folded into wqkv).
        s = jnp.einsum('btd,bsd->bts', q_h, k_h,
                       preferred_element_type=jnp.float32) + bias
        m = jnp.max(s, axis=-1, keepdims=True)
        p = jnp.exp(s - m)                                     # f32
        l = jnp.sum(p, axis=-1, keepdims=True)                 # (Bb, T, 1), >= 1
        ctx_h = jnp.einsum('bts,bsd->btd', p.astype(op_dtype), v_h,
                           preferred_element_type=jnp.float32)
        ctx_heads.append(ctx_h / l)                            # exact normalization

    # ---- Re-assemble heads along lanes, then ONE output-projection GEMM.
    ctx = jnp.concatenate(ctx_heads, axis=-1)                  # (Bb, T, d_out)
    ctx_flat = ctx.reshape(Bb * T, d_out).astype(op_dtype)     # leading merge: free
    out2 = jnp.dot(ctx_flat, wo_ref[...],
                   preferred_element_type=jnp.float32) + bo_ref[...]
    o_ref[...] = out2.reshape(Bb, T, d_out).astype(o_ref.dtype)


def _vmem_limit_bytes(block_b, T, d_in, d_out, op_bytes):
    f32 = 4
    live = (
        2 * block_b * T * d_in * op_bytes                # x block (double-buffered)
        + 2 * block_b * T * d_out * f32                  # out block (double-buffered)
        + (d_in * 3 * d_out + d_out * d_out + d_out) * op_bytes   # weights
        + block_b * T * 3 * d_out * (f32 + op_bytes)     # qkv acc + operand copy
        + 3 * block_b * T * T * f32                      # scores / probs temporaries
        + 2 * block_b * T * d_out * f32                  # ctx + out-proj accumulator
    )
    est = 2 * live                                       # headroom for compiler temps
    return int(min(max(est, 16 * 1024 * 1024), 64 * 1024 * 1024))


def multi_head_attention(x, wq, wk, wv, wo, bo, *, num_heads, block_b=None,
                         matmul_dtype=None):
    """x: (B, T, d_in); wq/wk/wv: (d_in, d_out); wo: (d_out, d_out); bo: (d_out,).

    Weights are in (in, out) layout (PyTorch nn.Linear weights pre-transposed
    once at load time).  Returns (B, T, d_out) in x's original dtype.
    matmul_dtype=jnp.bfloat16 keeps every MXU operand in bf16 (f32 accumulation,
    f32 softmax) -- recommended on v6e / v7x.
    """
    B, T, d_in = x.shape
    d_out = wq.shape[1]
    assert d_out % num_heads == 0
    head_dim = d_out // num_heads
    out_dtype = x.dtype

    if block_b is None:
        # >= 2 grid steps: DMA/compute pipelining + v7x two-TensorCore sharding.
        block_b = B // 2 if (B % 2 == 0 and B >= 2) else B
    assert B % block_b == 0

    # Fuse QKV weights ([Q | K | V], each head-major) and fold 1/sqrt(hd) into
    # the Q columns so the (T, T) scores never need per-element scaling.
    scale = 1.0 / (float(head_dim) ** 0.5)
    wqkv = jnp.concatenate([wq * scale, wk, wv], axis=1)       # (d_in, 3*d_out)
    op_dtype = jnp.dtype(matmul_dtype) if matmul_dtype is not None else jnp.dtype(jnp.float32)
    x_c = x.astype(op_dtype)
    wqkv = wqkv.astype(op_dtype)
    wo_c = wo.astype(op_dtype)
    bo2 = bo.reshape(1, d_out).astype(jnp.float32)             # added in f32

    kernel = functools.partial(_mha_kernel, num_heads=num_heads, head_dim=head_dim)
    compiler_params = pltpu.CompilerParams(
        dimension_semantics=("parallel",),
        vmem_limit_bytes=_vmem_limit_bytes(block_b, T, d_in, d_out, op_dtype.itemsize),
    )

    def build_and_call(single_buffer_weights):
        def weight_spec(shape):
            index_map = lambda b: (0,) * len(shape)
            if single_buffer_weights:
                # Grid-invariant weights: one VMEM buffer instead of two.
                return pl.BlockSpec(shape, index_map, pipeline_mode=pl.Buffered(1))
            return pl.BlockSpec(shape, index_map)

        grid_spec = pltpu.PrefetchScalarGridSpec(
            num_scalar_prefetch=0,
            grid=(B // block_b,),
            in_specs=[
                pl.BlockSpec((block_b, T, d_in), lambda b: (b, 0, 0)),
                weight_spec((d_in, 3 * d_out)),
                weight_spec((d_out, d_out)),
                weight_spec((1, d_out)),
            ],
            out_specs=pl.BlockSpec((block_b, T, d_out), lambda b: (b, 0, 0)),
        )
        return pl.pallas_call(
            kernel,
            out_shape=jax.ShapeDtypeStruct((B, T, d_out), out_dtype),
            grid_spec=grid_spec,
            compiler_params=compiler_params,
        )(x_c, wqkv, wo_c, bo2)

    try:
        return build_and_call(single_buffer_weights=True)
    except Exception:
        # pipeline_mode=pl.Buffered(1) unavailable in this jax build; fall back
        # to (harmlessly) double-buffered weights.
        return build_and_call(single_buffer_weights=False)


def _reference(x, wq, wk, wv, wo, bo, *, num_heads):
    """Pure-JAX reference mirroring the PyTorch forward (eval mode)."""
    B, T, d_in = x.shape
    d_out = wq.shape[1]
    hd = d_out // num_heads
    q = (x @ wq).reshape(B, T, num_heads, hd).transpose(0, 2, 1, 3)
    k = (x @ wk).reshape(B, T, num_heads, hd).transpose(0, 2, 1, 3)
    v = (x @ wv).reshape(B, T, num_heads, hd).transpose(0, 2, 1, 3)
    s = jnp.einsum("bhqd,bhkd->bhqk", q, k)
    mask = jnp.triu(jnp.ones((T, T), dtype=bool), k=1)
    s = jnp.where(mask, -jnp.inf, s)
    a = jax.nn.softmax(s / (hd ** 0.5), axis=-1)
    ctx = jnp.einsum("bhqk,bhkd->bhqd", a, v).transpose(0, 2, 1, 3).reshape(B, T, d_out)
    return ctx @ wo + bo


if __name__ == "__main__":
    # Module hyperparameters (small, consistent with the forward):
    B, T = 2, 8
    d_in, d_out = 32, 32
    num_heads = 4

    key = jax.random.PRNGKey(0)
    kx, kq, kk, kv, ko, kb = jax.random.split(key, 6)

    x = jax.random.normal(kx, (B, T, d_in), dtype=jnp.float32)
    # Deterministic synthetic parameters (Linear weights in (in, out) layout).
    wq = jax.random.normal(kq, (d_in, d_out), dtype=jnp.float32) * 0.1
    wk = jax.random.normal(kk, (d_in, d_out), dtype=jnp.float32) * 0.1
    wv = jax.random.normal(kv, (d_in, d_out), dtype=jnp.float32) * 0.1
    wo = jax.random.normal(ko, (d_out, d_out), dtype=jnp.float32) * 0.1
    bo = jax.random.normal(kb, (d_out,), dtype=jnp.float32) * 0.1

    ref = _reference(x, wq, wk, wv, wo, bo, num_heads=num_heads)

    # f32-operand path (exact softmax normalization -> tight tolerance).
    out = multi_head_attention(x, wq, wk, wv, wo, bo, num_heads=num_heads)
    out = jax.block_until_ready(out)
    assert out.shape == (B, T, d_out)
    assert jnp.allclose(out, ref, atol=2e-3, rtol=2e-3), "f32 path mismatch vs reference"

    # bf16 MXU-operand path (v6e/v7x feedback); softmax/mask stay in f32.
    out_bf16 = multi_head_attention(x, wq, wk, wv, wo, bo, num_heads=num_heads,
                                    matmul_dtype=jnp.bfloat16)
    out_bf16 = jax.block_until_ready(out_bf16)
    assert out_bf16.shape == (B, T, d_out)
    assert jnp.allclose(out_bf16, ref, atol=5e-2, rtol=5e-2), "bf16 path mismatch vs reference"

    print("KERNEL_OK")
</pallas_src>

<mosaic_0001>
module attributes {stable_mosaic.version = 11 : i64} {
  func.func @_mha_kernel(%arg0: i32, %arg1: memref<1x8x32xf32, #tpu.memory_space<vmem>>, %arg2: memref<32x96xf32, #tpu.memory_space<vmem>>, %arg3: memref<32x32xf32, #tpu.memory_space<vmem>>, %arg4: memref<1x32xf32, #tpu.memory_space<vmem>>, %arg5: memref<1x8x32xf32, #tpu.memory_space<vmem>>) attributes {dimension_semantics = [#tpu.dimension_semantics<parallel>], iteration_bounds = array<i64: 2>, scalar_prefetch = 0 : i64, scratch_operands = 0 : i64, tpu.core_type = #tpu.core_type<tc>, window_params = [{transform_indices = @transform_0, window_bounds = array<i64: 1, 8, 32>}, {pipeline_mode = #tpu.pipeline_mode<synchronous>, transform_indices = @transform_1, window_bounds = array<i64: 32, 96>}, {pipeline_mode = #tpu.pipeline_mode<synchronous>, transform_indices = @transform_2, window_bounds = array<i64: 32, 32>}, {pipeline_mode = #tpu.pipeline_mode<synchronous>, transform_indices = @transform_3, window_bounds = array<i64: 1, 32>}, {transform_indices = @transform_4, window_bounds = array<i64: 1, 8, 32>}]} {
    %c0 = arith.constant 0 : index
    %c0_0 = arith.constant 0 : index
    %c0_1 = arith.constant 0 : index
    %0 = vector.load %arg1[%c0, %c0_0, %c0_1] : memref<1x8x32xf32, #tpu.memory_space<vmem>>, vector<1x8x32xf32>
    %1 = vector.shape_cast %0 : vector<1x8x32xf32> to vector<8x32xf32>
    %c0_2 = arith.constant 0 : index
    %c0_3 = arith.constant 0 : index
    %2 = vector.load %arg2[%c0_2, %c0_3] : memref<32x96xf32, #tpu.memory_space<vmem>>, vector<32x96xf32>
    %cst = arith.constant dense<0.000000e+00> : vector<8x96xf32>
    %3 = tpu.matmul %1, %2, %cst {dimension_numbers = #tpu.dot_dimension_numbers<[1], [0], [0], [1], [0, 0, 1, 1], [], []>} : vector<8x32xf32>, vector<32x96xf32>, vector<8x96xf32> -> vector<8x96xf32>
    %4 = vector.shape_cast %3 : vector<8x96xf32> to vector<1x8x96xf32>
    %5 = tpu.iota {dimensions = array<i32: 0>} : vector<8x8xi32>
    %6 = tpu.iota {dimensions = array<i32: 1>} : vector<8x8xi32>
    %7 = arith.cmpi sle, %6, %5 : vector<8x8xi32>
    %cst_4 = arith.constant 0.000000e+00 : f32
    %cst_5 = arith.constant -1.000000e+30 : f32
    %8 = vector.broadcast %cst_4 : f32 to vector<8x8xf32>
    %9 = vector.broadcast %cst_5 : f32 to vector<8x8xf32>
    %10 = arith.select %7, %8, %9 : vector<8x8xi1>, vector<8x8xf32>
    %11 = vector.extract_strided_slice %4 {offsets = [0, 0, 0], sizes = [1, 8, 8], strides = [1, 1, 1]} : vector<1x8x96xf32> to vector<1x8x8xf32>
    %12 = vector.extract_strided_slice %4 {offsets = [0, 0, 32], sizes = [1, 8, 8], strides = [1, 1, 1]} : vector<1x8x96xf32> to vector<1x8x8xf32>
    %13 = vector.extract_strided_slice %4 {offsets = [0, 0, 64], sizes = [1, 8, 8], strides = [1, 1, 1]} : vector<1x8x96xf32> to vector<1x8x8xf32>
    "tpu.trace_start"() <{level = 10 : i32, message = "btd,bsd->bts"}> : () -> ()
    %cst_6 = arith.constant dense<0.000000e+00> : vector<1x8x8xf32>
    %14 = tpu.matmul %11, %12, %cst_6 {dimension_numbers = #tpu.dot_dimension_numbers<[2], [2], [1], [1], [0, 0, 0, 1, 1, 1], [0], [0]>} : vector<1x8x8xf32>, vector<1x8x8xf32>, vector<1x8x8xf32> -> vector<1x8x8xf32>
    "tpu.trace_stop"() : () -> ()
    %15 = vector.shape_cast %10 : vector<8x8xf32> to vector<1x8x8xf32>
    %16 = arith.addf %14, %15 : vector<1x8x8xf32>
    %cst_7 = arith.constant dense<0xFF800000> : vector<1x8xf32>
    %17 = vector.multi_reduction <maximumf>, %16, %cst_7 [2] : vector<1x8x8xf32> to vector<1x8xf32>
    %18 = vector.shape_cast %17 : vector<1x8xf32> to vector<1x8x1xf32>
    %19 = vector.broadcast %18 : vector<1x8x1xf32> to vector<1x8x8xf32>
    %20 = arith.subf %16, %19 : vector<1x8x8xf32>
    %21 = math.exp %20 : vector<1x8x8xf32>
    %cst_8 = arith.constant dense<0.000000e+00> : vector<1x8xf32>
    %22 = vector.multi_reduction <add>, %21, %cst_8 [2] : vector<1x8x8xf32> to vector<1x8xf32>
    %23 = vector.shape_cast %22 : vector<1x8xf32> to vector<1x8x1xf32>
    "tpu.trace_start"() <{level = 10 : i32, message = "bts,bsd->btd"}> : () -> ()
    %cst_9 = arith.constant dense<0.000000e+00> : vector<1x8x8xf32>
    %24 = tpu.matmul %21, %13, %cst_9 {dimension_numbers = #tpu.dot_dimension_numbers<[2], [1], [1], [2], [0, 0, 0, 1, 1, 2], [0], [0]>} : vector<1x8x8xf32>, vector<1x8x8xf32>, vector<1x8x8xf32> -> vector<1x8x8xf32>
    "tpu.trace_stop"() : () -> ()
    %25 = vector.broadcast %23 : vector<1x8x1xf32> to vector<1x8x8xf32>
    %26 = arith.divf %24, %25 : vector<1x8x8xf32>
    %27 = vector.extract_strided_slice %4 {offsets = [0, 0, 8], sizes = [1, 8, 8], strides = [1, 1, 1]} : vector<1x8x96xf32> to vector<1x8x8xf32>
    %28 = vector.extract_strided_slice %4 {offsets = [0, 0, 40], sizes = [1, 8, 8], strides = [1, 1, 1]} : vector<1x8x96xf32> to vector<1x8x8xf32>
    %29 = vector.extract_strided_slice %4 {offsets = [0, 0, 72], sizes = [1, 8, 8], strides = [1, 1, 1]} : vector<1x8x96xf32> to vector<1x8x8xf32>
    "tpu.trace_start"() <{level = 10 : i32, message = "btd,bsd->bts"}> : () -> ()
    %cst_10 = arith.constant dense<0.000000e+00> : vector<1x8x8xf32>
    %30 = tpu.matmul %27, %28, %cst_10 {dimension_numbers = #tpu.dot_dimension_numbers<[2], [2], [1], [1], [0, 0, 0, 1, 1, 1], [0], [0]>} : vector<1x8x8xf32>, vector<1x8x8xf32>, vector<1x8x8xf32> -> vector<1x8x8xf32>
    "tpu.trace_stop"() : () -> ()
    %31 = vector.shape_cast %10 : vector<8x8xf32> to vector<1x8x8xf32>
    %32 = arith.addf %30, %31 : vector<1x8x8xf32>
    %cst_11 = arith.constant dense<0xFF800000> : vector<1x8xf32>
    %33 = vector.multi_reduction <maximumf>, %32, %cst_11 [2] : vector<1x8x8xf32> to vector<1x8xf32>
    %34 = vector.shape_cast %33 : vector<1x8xf32> to vector<1x8x1xf32>
    %35 = vector.broadcast %34 : vector<1x8x1xf32> to vector<1x8x8xf32>
    %36 = arith.subf %32, %35 : vector<1x8x8xf32>
    %37 = math.exp %36 : vector<1x8x8xf32>
    %cst_12 = arith.constant dense<0.000000e+00> : vector<1x8xf32>
    %38 = vector.multi_reduction <add>, %37, %cst_12 [2] : vector<1x8x8xf32> to vector<1x8xf32>
    %39 = vector.shape_cast %38 : vector<1x8xf32> to vector<1x8x1xf32>
    "tpu.trace_start"() <{level = 10 : i32, message = "bts,bsd->btd"}> : () -> ()
    %cst_13 = arith.constant dense<0.000000e+00> : vector<1x8x8xf32>
    %40 = tpu.matmul %37, %29, %cst_13 {dimension_numbers = #tpu.dot_dimension_numbers<[2], [1], [1], [2], [0, 0, 0, 1, 1, 2], [0], [0]>} : vector<1x8x8xf32>, vector<1x8x8xf32>, vector<1x8x8xf32> -> vector<1x8x8xf32>
    "tpu.trace_stop"() : () -> ()
    %41 = vector.broadcast %39 : vector<1x8x1xf32> to vector<1x8x8xf32>
    %42 = arith.divf %40, %41 : vector<1x8x8xf32>
    %43 = vector.extract_strided_slice %4 {offsets = [0, 0, 16], sizes = [1, 8, 8], strides = [1, 1, 1]} : vector<1x8x96xf32> to vector<1x8x8xf32>
    %44 = vector.extract_strided_slice %4 {offsets = [0, 0, 48], sizes = [1, 8, 8], strides = [1, 1, 1]} : vector<1x8x96xf32> to vector<1x8x8xf32>
    %45 = vector.extract_strided_slice %4 {offsets = [0, 0, 80], sizes = [1, 8, 8], strides = [1, 1, 1]} : vector<1x8x96xf32> to vector<1x8x8xf32>
    "tpu.trace_start"() <{level = 10 : i32, message = "btd,bsd->bts"}> : () -> ()
    %cst_14 = arith.constant dense<0.000000e+00> : vector<1x8x8xf32>
    %46 = tpu.matmul %43, %44, %cst_14 {dimension_numbers = #tpu.dot_dimension_numbers<[2], [2], [1], [1], [0, 0, 0, 1, 1, 1], [0], [0]>} : vector<1x8x8xf32>, vector<1x8x8xf32>, vector<1x8x8xf32> -> vector<1x8x8xf32>
    "tpu.trace_stop"() : () -> ()
    %47 = vector.shape_cast %10 : vector<8x8xf32> to vector<1x8x8xf32>
    %48 = arith.addf %46, %47 : vector<1x8x8xf32>
    %cst_15 = arith.constant dense<0xFF800000> : vector<1x8xf32>
    %49 = vector.multi_reduction <maximumf>, %48, %cst_15 [2] : vector<1x8x8xf32> to vector<1x8xf32>
    %50 = vector.shape_cast %49 : vector<1x8xf32> to vector<1x8x1xf32>
    %51 = vector.broadcast %50 : vector<1x8x1xf32> to vector<1x8x8xf32>
    %52 = arith.subf %48, %51 : vector<1x8x8xf32>
    %53 = math.exp %52 : vector<1x8x8xf32>
    %cst_16 = arith.constant dense<0.000000e+00> : vector<1x8xf32>
    %54 = vector.multi_reduction <add>, %53, %cst_16 [2] : vector<1x8x8xf32> to vector<1x8xf32>
    %55 = vector.shape_cast %54 : vector<1x8xf32> to vector<1x8x1xf32>
    "tpu.trace_start"() <{level = 10 : i32, message = "bts,bsd->btd"}> : () -> ()
    %cst_17 = arith.constant dense<0.000000e+00> : vector<1x8x8xf32>
    %56 = tpu.matmul %53, %45, %cst_17 {dimension_numbers = #tpu.dot_dimension_numbers<[2], [1], [1], [2], [0, 0, 0, 1, 1, 2], [0], [0]>} : vector<1x8x8xf32>, vector<1x8x8xf32>, vector<1x8x8xf32> -> vector<1x8x8xf32>
    "tpu.trace_stop"() : () -> ()
    %57 = vector.broadcast %55 : vector<1x8x1xf32> to vector<1x8x8xf32>
    %58 = arith.divf %56, %57 : vector<1x8x8xf32>
    %59 = vector.extract_strided_slice %4 {offsets = [0, 0, 24], sizes = [1, 8, 8], strides = [1, 1, 1]} : vector<1x8x96xf32> to vector<1x8x8xf32>
    %60 = vector.extract_strided_slice %4 {offsets = [0, 0, 56], sizes = [1, 8, 8], strides = [1, 1, 1]} : vector<1x8x96xf32> to vector<1x8x8xf32>
    %61 = vector.extract_strided_slice %4 {offsets = [0, 0, 88], sizes = [1, 8, 8], strides = [1, 1, 1]} : vector<1x8x96xf32> to vector<1x8x8xf32>
    "tpu.trace_start"() <{level = 10 : i32, message = "btd,bsd->bts"}> : () -> ()
    %cst_18 = arith.constant dense<0.000000e+00> : vector<1x8x8xf32>
    %62 = tpu.matmul %59, %60, %cst_18 {dimension_numbers = #tpu.dot_dimension_numbers<[2], [2], [1], [1], [0, 0, 0, 1, 1, 1], [0], [0]>} : vector<1x8x8xf32>, vector<1x8x8xf32>, vector<1x8x8xf32> -> vector<1x8x8xf32>
    "tpu.trace_stop"() : () -> ()
    %63 = vector.shape_cast %10 : vector<8x8xf32> to vector<1x8x8xf32>
    %64 = arith.addf %62, %63 : vector<1x8x8xf32>
    %cst_19 = arith.constant dense<0xFF800000> : vector<1x8xf32>
    %65 = vector.multi_reduction <maximumf>, %64, %cst_19 [2] : vector<1x8x8xf32> to vector<1x8xf32>
    %66 = vector.shape_cast %65 : vector<1x8xf32> to vector<1x8x1xf32>
    %67 = vector.broadcast %66 : vector<1x8x1xf32> to vector<1x8x8xf32>
    %68 = arith.subf %64, %67 : vector<1x8x8xf32>
    %69 = math.exp %68 : vector<1x8x8xf32>
    %cst_20 = arith.constant dense<0.000000e+00> : vector<1x8xf32>
    %70 = vector.multi_reduction <add>, %69, %cst_20 [2] : vector<1x8x8xf32> to vector<1x8xf32>
    %71 = vector.shape_cast %70 : vector<1x8xf32> to vector<1x8x1xf32>
    "tpu.trace_start"() <{level = 10 : i32, message = "bts,bsd->btd"}> : () -> ()
    %cst_21 = arith.constant dense<0.000000e+00> : vector<1x8x8xf32>
    %72 = tpu.matmul %69, %61, %cst_21 {dimension_numbers = #tpu.dot_dimension_numbers<[2], [1], [1], [2], [0, 0, 0, 1, 1, 2], [0], [0]>} : vector<1x8x8xf32>, vector<1x8x8xf32>, vector<1x8x8xf32> -> vector<1x8x8xf32>
    "tpu.trace_stop"() : () -> ()
    %73 = vector.broadcast %71 : vector<1x8x1xf32> to vector<1x8x8xf32>
    %74 = arith.divf %72, %73 : vector<1x8x8xf32>
    %75 = tpu.concatenate %26, %42, %58, %74 in 2 : vector<1x8x8xf32>, vector<1x8x8xf32>, vector<1x8x8xf32>, vector<1x8x8xf32> -> vector<1x8x32xf32>
    %76 = vector.shape_cast %75 : vector<1x8x32xf32> to vector<8x32xf32>
    %c0_22 = arith.constant 0 : index
    %c0_23 = arith.constant 0 : index
    %77 = vector.load %arg3[%c0_22, %c0_23] : memref<32x32xf32, #tpu.memory_space<vmem>>, vector<32x32xf32>
    %cst_24 = arith.constant dense<0.000000e+00> : vector<8x32xf32>
    %78 = tpu.matmul %76, %77, %cst_24 {dimension_numbers = #tpu.dot_dimension_numbers<[1], [0], [0], [1], [0, 0, 1, 1], [], []>} : vector<8x32xf32>, vector<32x32xf32>, vector<8x32xf32> -> vector<8x32xf32>
    %c0_25 = arith.constant 0 : index
    %c0_26 = arith.constant 0 : index
    %79 = vector.load %arg4[%c0_25, %c0_26] : memref<1x32xf32, #tpu.memory_space<vmem>>, vector<1x32xf32>
    %80 = vector.broadcast %79 : vector<1x32xf32> to vector<8x32xf32>
    %81 = arith.addf %78, %80 : vector<8x32xf32>
    %82 = vector.shape_cast %81 : vector<8x32xf32> to vector<1x8x32xf32>
    %c0_27 = arith.constant 0 : index
    %c0_28 = arith.constant 0 : index
    %c0_29 = arith.constant 0 : index
    %83 = vector.load %arg5[%c0_27, %c0_28, %c0_29] : memref<1x8x32xf32, #tpu.memory_space<vmem>>, vector<1x8x32xf32>
    tpu.vector_store %arg5[%c0_27, %c0_28, %c0_29], %82 {strides = array<i32>} : memref<1x8x32xf32, #tpu.memory_space<vmem>>, vector<1x8x32xf32>,
    return
  }
  func.func @transform_0(%arg0: i32) -> (i32, i32, i32) {
    %c0_i32 = arith.constant 0 : i32
    %c0_i32_0 = arith.constant 0 : i32
    %c0_i32_1 = arith.constant 0 : i32
    return %arg0, %c0_i32, %c0_i32_0 : i32, i32, i32
  }
  func.func @transform_1(%arg0: i32) -> (i32, i32) {
    %c0_i32 = arith.constant 0 : i32
    %c0_i32_0 = arith.constant 0 : i32
    %c0_i32_1 = arith.constant 0 : i32
    return %c0_i32, %c0_i32_0 : i32, i32
  }
  func.func @transform_2(%arg0: i32) -> (i32, i32) {
    %c0_i32 = arith.constant 0 : i32
    %c0_i32_0 = arith.constant 0 : i32
    %c0_i32_1 = arith.constant 0 : i32
    return %c0_i32, %c0_i32_0 : i32, i32
  }
  func.func @transform_3(%arg0: i32) -> (i32, i32) {
    %c0_i32 = arith.constant 0 : i32
    %c0_i32_0 = arith.constant 0 : i32
    %c0_i32_1 = arith.constant 0 : i32
    return %c0_i32, %c0_i32_0 : i32, i32
  }
  func.func @transform_4(%arg0: i32) -> (i32, i32, i32) {
    %c0_i32 = arith.constant 0 : i32
    %c0_i32_0 = arith.constant 0 : i32
    %c0_i32_1 = arith.constant 0 : i32
    return %arg0, %c0_i32, %c0_i32_0 : i32, i32, i32
  }
}

module attributes {stable_mosaic.version = 11 : i64} {
  func.func @_mha_kernel(%arg0: i32, %arg1: memref<1x8x32xf32, #tpu.memory_space<vmem>>, %arg2: memref<32x96xf32, #tpu.memory_space<vmem>>, %arg3: memref<32x32xf32, #tpu.memory_space<vmem>>, %arg4: memref<1x32xf32, #tpu.memory_space<vmem>>, %arg5: memref<1x8x32xf32, #tpu.memory_space<vmem>>) attributes {dimension_semantics = [#tpu.dimension_semantics<parallel>], iteration_bounds = array<i64: 2>, scalar_prefetch = 0 : i64, scratch_operands = 0 : i64, tpu.core_type = #tpu.core_type<tc>, window_params = [{transform_indices = @transform_0, window_bounds = array<i64: 1, 8, 32>}, {pipeline_mode = #tpu.pipeline_mode<synchronous>, transform_indices = @transform_1, window_bounds = array<i64: 32, 96>}, {pipeline_mode = #tpu.pipeline_mode<synchronous>, transform_indices = @transform_2, window_bounds = array<i64: 32, 32>}, {pipeline_mode = #tpu.pipeline_mode<synchronous>, transform_indices = @transform_3, window_bounds = array<i64: 1, 32>}, {transform_indices = @transform_4, window_bounds = array<i64: 1, 8, 32>}]} {
    %c0 = arith.constant 0 : index
    %c0_0 = arith.constant 0 : index
    %c0_1 = arith.constant 0 : index
    %0 = vector.load %arg1[%c0, %c0_0, %c0_1] : memref<1x8x32xf32, #tpu.memory_space<vmem>>, vector<1x8x32xf32>
    %1 = vector.shape_cast %0 : vector<1x8x32xf32> to vector<8x32xf32>
    %c0_2 = arith.constant 0 : index
    %c0_3 = arith.constant 0 : index
    %2 = vector.load %arg2[%c0_2, %c0_3] : memref<32x96xf32, #tpu.memory_space<vmem>>, vector<32x96xf32>
    %cst = arith.constant dense<0.000000e+00> : vector<8x96xf32>
    %3 = tpu.matmul %1, %2, %cst {dimension_numbers = #tpu.dot_dimension_numbers<[1], [0], [0], [1], [0, 0, 1, 1], [], []>} : vector<8x32xf32>, vector<32x96xf32>, vector<8x96xf32> -> vector<8x96xf32>
    %4 = vector.shape_cast %3 : vector<8x96xf32> to vector<1x8x96xf32>
    %5 = tpu.iota {dimensions = array<i32: 0>} : vector<8x8xi32>
    %6 = tpu.iota {dimensions = array<i32: 1>} : vector<8x8xi32>
    %7 = arith.cmpi sle, %6, %5 : vector<8x8xi32>
    %cst_4 = arith.constant 0.000000e+00 : f32
    %cst_5 = arith.constant -1.000000e+30 : f32
    %8 = vector.broadcast %cst_4 : f32 to vector<8x8xf32>
    %9 = vector.broadcast %cst_5 : f32 to vector<8x8xf32>
    %10 = arith.select %7, %8, %9 : vector<8x8xi1>, vector<8x8xf32>
    %11 = vector.extract_strided_slice %4 {offsets = [0, 0, 0], sizes = [1, 8, 8], strides = [1, 1, 1]} : vector<1x8x96xf32> to vector<1x8x8xf32>
    %12 = vector.extract_strided_slice %4 {offsets = [0, 0, 32], sizes = [1, 8, 8], strides = [1, 1, 1]} : vector<1x8x96xf32> to vector<1x8x8xf32>
    %13 = vector.extract_strided_slice %4 {offsets = [0, 0, 64], sizes = [1, 8, 8], strides = [1, 1, 1]} : vector<1x8x96xf32> to vector<1x8x8xf32>
    "tpu.trace_start"() <{level = 10 : i32, message = "btd,bsd->bts"}> : () -> ()
    %cst_6 = arith.constant dense<0.000000e+00> : vector<1x8x8xf32>
    %14 = tpu.matmul %11, %12, %cst_6 {dimension_numbers = #tpu.dot_dimension_numbers<[2], [2], [1], [1], [0, 0, 0, 1, 1, 1], [0], [0]>} : vector<1x8x8xf32>, vector<1x8x8xf32>, vector<1x8x8xf32> -> vector<1x8x8xf32>
    "tpu.trace_stop"() : () -> ()
    %15 = vector.shape_cast %10 : vector<8x8xf32> to vector<1x8x8xf32>
    %16 = arith.addf %14, %15 : vector<1x8x8xf32>
    %cst_7 = arith.constant dense<0xFF800000> : vector<1x8xf32>
    %17 = vector.multi_reduction <maximumf>, %16, %cst_7 [2] : vector<1x8x8xf32> to vector<1x8xf32>
    %18 = vector.shape_cast %17 : vector<1x8xf32> to vector<1x8x1xf32>
    %19 = vector.broadcast %18 : vector<1x8x1xf32> to vector<1x8x8xf32>
    %20 = arith.subf %16, %19 : vector<1x8x8xf32>
    %21 = math.exp %20 : vector<1x8x8xf32>
    %cst_8 = arith.constant dense<0.000000e+00> : vector<1x8xf32>
    %22 = vector.multi_reduction <add>, %21, %cst_8 [2] : vector<1x8x8xf32> to vector<1x8xf32>
    %23 = vector.shape_cast %22 : vector<1x8xf32> to vector<1x8x1xf32>
    "tpu.trace_start"() <{level = 10 : i32, message = "bts,bsd->btd"}> : () -> ()
    %cst_9 = arith.constant dense<0.000000e+00> : vector<1x8x8xf32>
    %24 = tpu.matmul %21, %13, %cst_9 {dimension_numbers = #tpu.dot_dimension_numbers<[2], [1], [1], [2], [0, 0, 0, 1, 1, 2], [0], [0]>} : vector<1x8x8xf32>, vector<1x8x8xf32>, vector<1x8x8xf32> -> vector<1x8x8xf32>
    "tpu.trace_stop"() : () -> ()
    %25 = vector.broadcast %23 : vector<1x8x1xf32> to vector<1x8x8xf32>
    %26 = arith.divf %24, %25 : vector<1x8x8xf32>
    %27 = vector.extract_strided_slice %4 {offsets = [0, 0, 8], sizes = [1, 8, 8], strides = [1, 1, 1]} : vector<1x8x96xf32> to vector<1x8x8xf32>
    %28 = vector.extract_strided_slice %4 {offsets = [0, 0, 40], sizes = [1, 8, 8], strides = [1, 1, 1]} : vector<1x8x96xf32> to vector<1x8x8xf32>
    %29 = vector.extract_strided_slice %4 {offsets = [0, 0, 72], sizes = [1, 8, 8], strides = [1, 1, 1]} : vector<1x8x96xf32> to vector<1x8x8xf32>
    "tpu.trace_start"() <{level = 10 : i32, message = "btd,bsd->bts"}> : () -> ()
    %cst_10 = arith.constant dense<0.000000e+00> : vector<1x8x8xf32>
    %30 = tpu.matmul %27, %28, %cst_10 {dimension_numbers = #tpu.dot_dimension_numbers<[2], [2], [1], [1], [0, 0, 0, 1, 1, 1], [0], [0]>} : vector<1x8x8xf32>, vector<1x8x8xf32>, vector<1x8x8xf32> -> vector<1x8x8xf32>
    "tpu.trace_stop"() : () -> ()
    %31 = vector.shape_cast %10 : vector<8x8xf32> to vector<1x8x8xf32>
    %32 = arith.addf %30, %31 : vector<1x8x8xf32>
    %cst_11 = arith.constant dense<0xFF800000> : vector<1x8xf32>
    %33 = vector.multi_reduction <maximumf>, %32, %cst_11 [2] : vector<1x8x8xf32> to vector<1x8xf32>
    %34 = vector.shape_cast %33 : vector<1x8xf32> to vector<1x8x1xf32>
    %35 = vector.broadcast %34 : vector<1x8x1xf32> to vector<1x8x8xf32>
    %36 = arith.subf %32, %35 : vector<1x8x8xf32>
    %37 = math.exp %36 : vector<1x8x8xf32>
    %cst_12 = arith.constant dense<0.000000e+00> : vector<1x8xf32>
    %38 = vector.multi_reduction <add>, %37, %cst_12 [2] : vector<1x8x8xf32> to vector<1x8xf32>
    %39 = vector.shape_cast %38 : vector<1x8xf32> to vector<1x8x1xf32>
    "tpu.trace_start"() <{level = 10 : i32, message = "bts,bsd->btd"}> : () -> ()
    %cst_13 = arith.constant dense<0.000000e+00> : vector<1x8x8xf32>
    %40 = tpu.matmul %37, %29, %cst_13 {dimension_numbers = #tpu.dot_dimension_numbers<[2], [1], [1], [2], [0, 0, 0, 1, 1, 2], [0], [0]>} : vector<1x8x8xf32>, vector<1x8x8xf32>, vector<1x8x8xf32> -> vector<1x8x8xf32>
    "tpu.trace_stop"() : () -> ()
    %41 = vector.broadcast %39 : vector<1x8x1xf32> to vector<1x8x8xf32>
    %42 = arith.divf %40, %41 : vector<1x8x8xf32>
    %43 = vector.extract_strided_slice %4 {offsets = [0, 0, 16], sizes = [1, 8, 8], strides = [1, 1, 1]} : vector<1x8x96xf32> to vector<1x8x8xf32>
    %44 = vector.extract_strided_slice %4 {offsets = [0, 0, 48], sizes = [1, 8, 8], strides = [1, 1, 1]} : vector<1x8x96xf32> to vector<1x8x8xf32>
    %45 = vector.extract_strided_slice %4 {offsets = [0, 0, 80], sizes = [1, 8, 8], strides = [1, 1, 1]} : vector<1x8x96xf32> to vector<1x8x8xf32>
    "tpu.trace_start"() <{level = 10 : i32, message = "btd,bsd->bts"}> : () -> ()
    %cst_14 = arith.constant dense<0.000000e+00> : vector<1x8x8xf32>
    %46 = tpu.matmul %43, %44, %cst_14 {dimension_numbers = #tpu.dot_dimension_numbers<[2], [2], [1], [1], [0, 0, 0, 1, 1, 1], [0], [0]>} : vector<1x8x8xf32>, vector<1x8x8xf32>, vector<1x8x8xf32> -> vector<1x8x8xf32>
    "tpu.trace_stop"() : () -> ()
    %47 = vector.shape_cast %10 : vector<8x8xf32> to vector<1x8x8xf32>
    %48 = arith.addf %46, %47 : vector<1x8x8xf32>
    %cst_15 = arith.constant dense<0xFF800000> : vector<1x8xf32>
    %49 = vector.multi_reduction <maximumf>, %48, %cst_15 [2] : vector<1x8x8xf32> to vector<1x8xf32>
    %50 = vector.shape_cast %49 : vector<1x8xf32> to vector<1x8x1xf32>
    %51 = vector.broadcast %50 : vector<1x8x1xf32> to vector<1x8x8xf32>
    %52 = arith.subf %48, %51 : vector<1x8x8xf32>
    %53 = math.exp %52 : vector<1x8x8xf32>
    %cst_16 = arith.constant dense<0.000000e+00> : vector<1x8xf32>
    %54 = vector.multi_reduction <add>, %53, %cst_16 [2] : vector<1x8x8xf32> to vector<1x8xf32>
    %55 = vector.shape_cast %54 : vector<1x8xf32> to vector<1x8x1xf32>
    "tpu.trace_start"() <{level = 10 : i32, message = "bts,bsd->btd"}> : () -> ()
    %cst_17 = arith.constant dense<0.000000e+00> : vector<1x8x8xf32>
    %56 = tpu.matmul %53, %45, %cst_17 {dimension_numbers = #tpu.dot_dimension_numbers<[2], [1], [1], [2], [0, 0, 0, 1, 1, 2], [0], [0]>} : vector<1x8x8xf32>, vector<1x8x8xf32>, vector<1x8x8xf32> -> vector<1x8x8xf32>
    "tpu.trace_stop"() : () -> ()
    %57 = vector.broadcast %55 : vector<1x8x1xf32> to vector<1x8x8xf32>
    %58 = arith.divf %56, %57 : vector<1x8x8xf32>
    %59 = vector.extract_strided_slice %4 {offsets = [0, 0, 24], sizes = [1, 8, 8], strides = [1, 1, 1]} : vector<1x8x96xf32> to vector<1x8x8xf32>
    %60 = vector.extract_strided_slice %4 {offsets = [0, 0, 56], sizes = [1, 8, 8], strides = [1, 1, 1]} : vector<1x8x96xf32> to vector<1x8x8xf32>
    %61 = vector.extract_strided_slice %4 {offsets = [0, 0, 88], sizes = [1, 8, 8], strides = [1, 1, 1]} : vector<1x8x96xf32> to vector<1x8x8xf32>
    "tpu.trace_start"() <{level = 10 : i32, message = "btd,bsd->bts"}> : () -> ()
    %cst_18 = arith.constant dense<0.000000e+00> : vector<1x8x8xf32>
    %62 = tpu.matmul %59, %60, %cst_18 {dimension_numbers = #tpu.dot_dimension_numbers<[2], [2], [1], [1], [0, 0, 0, 1, 1, 1], [0], [0]>} : vector<1x8x8xf32>, vector<1x8x8xf32>, vector<1x8x8xf32> -> vector<1x8x8xf32>
    "tpu.trace_stop"() : () -> ()
    %63 = vector.shape_cast %10 : vector<8x8xf32> to vector<1x8x8xf32>
    %64 = arith.addf %62, %63 : vector<1x8x8xf32>
    %cst_19 = arith.constant dense<0xFF800000> : vector<1x8xf32>
    %65 = vector.multi_reduction <maximumf>, %64, %cst_19 [2] : vector<1x8x8xf32> to vector<1x8xf32>
    %66 = vector.shape_cast %65 : vector<1x8xf32> to vector<1x8x1xf32>
    %67 = vector.broadcast %66 : vector<1x8x1xf32> to vector<1x8x8xf32>
    %68 = arith.subf %64, %67 : vector<1x8x8xf32>
    %69 = math.exp %68 : vector<1x8x8xf32>
    %cst_20 = arith.constant dense<0.000000e+00> : vector<1x8xf32>
    %70 = vector.multi_reduction <add>, %69, %cst_20 [2] : vector<1x8x8xf32> to vector<1x8xf32>
    %71 = vector.shape_cast %70 : vector<1x8xf32> to vector<1x8x1xf32>
    "tpu.trace_start"() <{level = 10 : i32, message = "bts,bsd->btd"}> : () -> ()
    %cst_21 = arith.constant dense<0.000000e+00> : vector<1x8x8xf32>
    %72 = tpu.matmul %69, %61, %cst_21 {dimension_numbers = #tpu.dot_dimension_numbers<[2], [1], [1], [2], [0, 0, 0, 1, 1, 2], [0], [0]>} : vector<1x8x8xf32>, vector<1x8x8xf32>, vector<1x8x8xf32> -> vector<1x8x8xf32>
    "tpu.trace_stop"() : () -> ()
    %73 = vector.broadcast %71 : vector<1x8x1xf32> to vector<1x8x8xf32>
    %74 = arith.divf %72, %73 : vector<1x8x8xf32>
    %75 = tpu.concatenate %26, %42, %58, %74 in 2 : vector<1x8x8xf32>, vector<1x8x8xf32>, vector<1x8x8xf32>, vector<1x8x8xf32> -> vector<1x8x32xf32>
    %76 = vector.shape_cast %75 : vector<1x8x32xf32> to vector<8x32xf32>
    %c0_22 = arith.constant 0 : index
    %c0_23 = arith.constant 0 : index
    %77 = vector.load %arg3[%c0_22, %c0_23] : memref<32x32xf32, #tpu.memory_space<vmem>>, vector<32x32xf32>
    %cst_24 = arith.constant dense<0.000000e+00> : vector<8x32xf32>
    %78 = tpu.matmul %76, %77, %cst_24 {dimension_numbers = #tpu.dot_dimension_numbers<[1], [0], [0], [1], [0, 0, 1, 1], [], []>} : vector<8x32xf32>, vector<32x32xf32>, vector<8x32xf32> -> vector<8x32xf32>
    %c0_25 = arith.constant 0 : index
    %c0_26 = arith.constant 0 : index
    %79 = vector.load %arg4[%c0_25, %c0_26] : memref<1x32xf32, #tpu.memory_space<vmem>>, vector<1x32xf32>
    %80 = vector.broadcast %79 : vector<1x32xf32> to vector<8x32xf32>
    %81 = arith.addf %78, %80 : vector<8x32xf32>
    %82 = vector.shape_cast %81 : vector<8x32xf32> to vector<1x8x32xf32>
    %c0_27 = arith.constant 0 : index
    %c0_28 = arith.constant 0 : index
    %c0_29 = arith.constant 0 : index
    %83 = vector.load %arg5[%c0_27, %c0_28, %c0_29] : memref<1x8x32xf32, #tpu.memory_space<vmem>>, vector<1x8x32xf32>
    tpu.vector_store %arg5[%c0_27, %c0_28, %c0_29], %82 {strides = array<i32>} : memref<1x8x32xf32, #tpu.memory_space<vmem>>, vector<1x8x32xf32>,
    return
  }
  func.func @transform_0(%arg0: i32) -> (i32, i32, i32) {
    %c0_i32 = arith.constant 0 : i32
    %c0_i32_0 = arith.constant 0 : i32
    %c0_i32_1 = arith.constant 0 : i32
    return %arg0, %c0_i32, %c0_i32_0 : i32, i32, i32
  }
  func.func @transform_1(%arg0: i32) -> (i32, i32) {
    %c0_i32 = arith.constant 0 : i32
    %c0_i32_0 = arith.constant 0 : i32
    %c0_i32_1 = arith.constant 0 : i32
    return %c0_i32, %c0_i32_0 : i32, i32
  }
  func.func @transform_2(%arg0: i32) -> (i32, i32) {
    %c0_i32 = arith.constant 0 : i32
    %c0_i32_0 = arith.constant 0 : i32
    %c0_i32_1 = arith.constant 0 : i32
    return %c0_i32, %c0_i32_0 : i32, i32
  }
  func.func @transform_3(%arg0: i32) -> (i32, i32) {
    %c0_i32 = arith.constant 0 : i32
    %c0_i32_0 = arith.constant 0 : i32
    %c0_i32_1 = arith.constant 0 : i32
    return %c0_i32, %c0_i32_0 : i32, i32
  }
  func.func @transform_4(%arg0: i32) -> (i32, i32, i32) {
    %c0_i32 = arith.constant 0 : i32
    %c0_i32_0 = arith.constant 0 : i32
    %c0_i32_1 = arith.constant 0 : i32
    return %arg0, %c0_i32, %c0_i32_0 : i32, i32, i32
  }
}

</mosaic_0001>

<bundles_post_ra>
// kernel: tpu_custom_call.1
= control target key start
LH: loop header
LB: loop body
LE: loop exit
PB: predicated region body
PF: predicated region fallthrough
CT: control target
= control target key end

     0   :  { %9 = vsyncpa [#allocation3], 0  ;;  %s1942_s0 = inlined_call_operand.hbm [shape: f32[2,8,32], index: 0, kind: input, shape index: {}]   ;;  %s1943_s1 = inlined_call_operand.hbm [shape: f32[32,96], index: 1, kind: input, shape index: {}]   ;;  %s1944_s2 = inlined_call_operand.hbm [shape: f32[32,32], index: 2, kind: input, shape index: {}]   ;;  %s1945_s3 = inlined_call_operand.vmem [shape: f32[1,32], index: 3, kind: input, shape index: {}]   ;;  %s1946_s4 = inlined_call_operand.hbm [shape: f32[2,8,32], index: 4, kind: output, shape index: {}]  }
   0x1   :  { %11 = vsyncpa [#allocation3 + $0x1], 0 }
   0x2   :  { %12 = vsyncpa [#allocation6], 0 }
   0x3   :  { %13 = vsyncpa [#allocation4], 0 }
   0x4   :  { %15 = vsyncpa [#allocation4 + $0x1], 0  ;;  %s1633_s15 = smov 0   ;;  %s1635_s16 = smov 0  }
   0x5   :  { %s1637_s17 = smov 0   ;;  %s1639_s18 = smov 0  }
   0x6 LB: > { %s1654_s19 = sadd.s32 4294967295, %s1582_s18   ;;  %s1192_s20 = sadd.s32 4294967294, %s1582_s18   ;;  %s1582_s18 = sphi %s1639_s18, %s1966_s18   ;;  %s1578_s17 = sphi %s1637_s17, %s1965_s17   ;;  %s1574_s16 = sphi %s1635_s16, %s1964_s16   ;;  %s1570_s15 = sphi %s1633_s15, %s1963_s15  }
   0x7   : > { %p41_p0 = scmp.ne.s32.totalorder %s1574_s16, %s1570_s15  ;;  %p1947_p1 = scmp.eq.s32.totalorder %s1654_s19, 0 }
   0x8   : > { %p134_p3 = scmp.eq.s32.totalorder %s1192_s20, 1  ;;  %p1193_p5 = scmp.ge.s32.totalorder %s1582_s18, 1 }
   0x9   : > { %p1663_p4 = por %p1947_p1, %p41_p0  ;;  %p141_p7 = scmp.lt.s32.totalorder %s1582_s18, 3 }
   0xa   : > { %p1668_p6 = por %p134_p3, %p41_p0  ;;  %s1584_s24 = smov [#allocation5]  }
   0xb   : > { %s1950_s21 = scalar_select %p1663_p4, 1, 0 }
   0xc   : > { %s1951_s22 = scalar_select %p1668_p6, 1, 0 }
   0xd   : > { %p1673_p8 = pnand %p1193_p5, %p141_p7  ;;  %s153_s25 = sshll.u32 %s1584_s24, 4  ;;  %s1677_s25 = int_to_ptr.vmem [resolvable:$true] %s153_s25 }
   0xe   : > { %s1585_s27 = smov [#allocation7]   ;;  %s1426_s5 = scalar_lea.hbm %s1943_s1, 512 }
   0xf   : > { %p1335_p9 = pneg %p1673_p8  ;;  %s166_s28 = sshll.u32 %s1585_s27, 4  ;;  %s1688_s28 = int_to_ptr.vmem [resolvable:$true] %s166_s28 }
  0x10   : > { %p1427_p12 = scmp.ne.s32.totalorder %s1943_s1, %s1426_s5  ;;  %p1433_p5 = scmp.lt.u32.totalorder %s1426_s5, %s1943_s1 }
  0x11   : > { %p1684_p11 = pnand %p1335_p9, %p1947_p1 }
  0x13   : > { %p1428_p13 = pneg %p1684_p11 }
  0x15   : > { %p1429_p0 = pnand %p1428_p13, %p1427_p12 }
  0x17   : > { %p1430_p3 = pneg %p1429_p0 }
  0x19   : > { %p1435_p7 = pnand %p1433_p5, %p1430_p3 }
  0x1b   : > { %1438 = shalt.err (!%p1435_p7)
}
  0x1c   : > { %s1439_s10 = scalar_lea.vmem %s1677_s25, 512  ;;  %p1447_p2 = scmp.lt.s32.totalorder %s1677_s25, %s1677_s25 }
  0x1d   : > { %p1440_p9 = scmp.ne.s32.totalorder %s1677_s25, %s1439_s10  ;;  %p1448_p12 = scmp.lt.s32.totalorder %s1439_s10, %s1439_s10 }
  0x1f   : > { %p1442_p10 = pnand %p1440_p9, %p1428_p13  ;;  %p1449_p0 = por %p1448_p12, %p1447_p2 }
  0x21   : > { %p1443_p1 = pneg %p1442_p10 }
  0x23   : > { %p1450_p6 = pnand %p1449_p0, %p1443_p1 }
  0x25   : > { %1453 = shalt.err (!%p1450_p6)
}
  0x26   : > { %s1586_s11 = smov 128   ;;  %s1587_s12 = smov 8  }
  0x27   : > { %1338 = dma.hbm_to_vmem [thread:$0]  (!%p1684_p11), %s1943_s1, 512, %s1677_s25, [#allocation6], %s1586_s11, %s1586_s11, %s1587_s12  }
  0x28   : > { %s1454_s27 = scalar_lea.hbm %s1944_s2, 512 }
  0x29   : > { %p1455_p2 = scmp.ne.s32.totalorder %s1944_s2, %s1454_s27  ;;  %p1461_p10 = scmp.lt.u32.totalorder %s1454_s27, %s1944_s2 }
  0x2b   : > { %p1457_p1 = pnand %p1455_p2, %p1428_p13 }
  0x2d   : > { %p1458_p6 = pneg %p1457_p1 }
  0x2f   : > { %p1463_p3 = pnand %p1461_p10, %p1458_p6 }
  0x31   : > { %1466 = shalt.err (!%p1463_p3)
}
  0x32   : > { %s1467_s25 = scalar_lea.vmem %s1688_s28, 512  ;;  %p1475_p12 = scmp.lt.s32.totalorder %s1688_s28, %s1688_s28 }
  0x33   : > { %p1468_p5 = scmp.ne.s32.totalorder %s1688_s28, %s1467_s25  ;;  %p1476_p0 = scmp.lt.s32.totalorder %s1467_s25, %s1467_s25 }
  0x35   : > { %p1470_p7 = pnand %p1468_p5, %p1428_p13  ;;  %p1477_p2 = por %p1476_p0, %p1475_p12 }
  0x37   : > { %p1471_p9 = pneg %p1470_p7 }
  0x39   : > { %p1478_p1 = pnand %p1477_p2, %p1471_p9 }
  0x3b   : > { %1481 = shalt.err (!%p1478_p1)
}
  0x3c   : > { %1341 = dma.hbm_to_vmem [thread:$0]  (!%p1684_p11), %s1944_s2, 512, %s1688_s28, [#allocation6], %s1586_s11, %s1586_s11, %s1587_s12  }
  0x3d   : > { %s1743_s9 = sadd.s32 1, %s1582_s18   ;;  %s28_s26 = sadd.s32 1, %s1578_s17 }
  0x3e   : > { %s25_s10 = ssub.s32 %s1582_s18, %s1743_s9  ;;  %p35_p13 = scmp.ne.s32.totalorder %s1578_s17, %s1574_s16 }
  0x3f   : > { %p26_p6 = scmp.eq.s32.totalorder %s25_s10, 0  ;;  %p36_p10 = scmp.eq.s32.totalorder %s1582_s18, 0 }
  0x40   : > { %p1954_p3 = scmp.eq.s32.totalorder %s1654_s19, 1  ;;  %p1352_p7 = scmp.lt.s32.totalorder %s1582_s18, 2 }
  0x41   : > { %s1759_s14 = scalar_select %p26_p6, %s1578_s17, %s28_s26  }
  0x42   : > { %p1753_p5 = por %p1954_p3, %p35_p13  ;;  %p37_p9 = por %p36_p10, %p35_p13 }
  0x43   : > { %s183_s20 = sand.u32 1, %s1578_s17   ;;  %s1198_s28 = sshll.u32 %s1582_s18, 7 }
  0x44   : > { %s1955_s13 = scalar_select %p1753_p5, 1, 0 }
  0x45   : > { %s1197_s24 = sshll.u32 %s183_s20, 3  ;;  %s1766_s27 = scalar_lea.hbm %s1942_s0, %s1198_s28 }
  0x46   : > { %s187_s29 = scalar_lea.vmem [#allocation2], %s1197_s24  ;;  %p1770_p11 = pnand %p1352_p7, %p37_p9 }
  0x47   : > { %s194_s30 = sshll.u32 %s187_s29, 4  ;;  %s184_s6 = scalar_lea.sflag [#allocation3], %s183_s20  ;;  %s1768_s30 = int_to_ptr.vmem [resolvable:$true] %s194_s30 }
  0x48   : > { %s1482_s25 = scalar_lea.hbm %s1766_s27, 128  ;;  %p1484_p0 = pneg %p1770_p11 }
  0x49   : > { %p1483_p12 = scmp.ne.s32.totalorder %s1766_s27, %s1482_s25  ;;  %s1487_s26 = scalar_lea.hbm %s1942_s0, 256 }
  0x4a   : > { %p1488_p13 = scmp.lt.u32.totalorder %s1766_s27, %s1942_s0  ;;  %p1489_p6 = scmp.lt.u32.totalorder %s1487_s26, %s1482_s25 }
  0x4b   : > { %p1485_p2 = pnand %p1484_p0, %p1483_p12  ;;  %p1491_p3 = scmp.lt.u32.totalorder %s1482_s25, %s1766_s27 }
  0x4c   : > { %p1490_p10 = por %p1489_p6, %p1488_p13 }
  0x4d   : > { %p1486_p1 = pneg %p1485_p2 }
  0x4e   : > { %p1492_p7 = por %p1491_p3, %p1490_p10 }
  0x50   : > { %p1493_p9 = pnand %p1492_p7, %p1486_p1 }
  0x52   : > { %1496 = shalt.err (!%p1493_p9)
}
  0x53   : > { %s1497_s20 = scalar_lea.vmem %s1768_s30, 128  ;;  %s1588_s28 = smov [#allocation2]  }
  0x54   : > { %p1498_p12 = scmp.ne.s32.totalorder %s1768_s30, %s1497_s20  ;;  %s1502_s11 = sshll.u32 %s1588_s28, 4  ;;  %s1503_s11 = int_to_ptr.vmem [resolvable:$false] %s1502_s11 }
  0x55   : > { %s1504_s12 = scalar_lea.vmem %s1503_s11, 256  ;;  %p1505_p4 = scmp.lt.s32.totalorder %s1768_s30, %s1503_s11 }
  0x56   : > { %p1500_p2 = pnand %p1498_p12, %p1484_p0  ;;  %p1506_p13 = scmp.lt.s32.totalorder %s1504_s12, %s1497_s20 }
  0x58   : > { %p1501_p5 = pneg %p1500_p2  ;;  %p1507_p6 = por %p1506_p13, %p1505_p4 }
  0x5a   : > { %p1508_p10 = pnand %p1507_p6, %p1501_p5 }
  0x5c   : > { %1511 = shalt.err (!%p1508_p10)
}
  0x5d   : > { %1345 = dma.hbm_to_vmem [thread:$0]  (!%p1770_p11), %s1766_s27, 128, %s1768_s30, %s184_s6  }
  0x5e   : > { %203 = sbr.rel (%p1673_p8) target bundleno = 1759 (0x6df), region = 36  ;;  %s1802_s29 = sand.u32 (!%p1673_p8), 1, %s1574_s16  }
  0x5f   : > { %s1200_s25 = sshll.u32 (!%p1673_p8), %s1802_s29, 3  ;;  %s206_s7 = scalar_lea.sflag (!%p1673_p8), [#allocation3], %s1802_s29 }
  0x60   : > { %s209_s8 = scalar_lea.vmem (!%p1673_p8), [#allocation2], %s1200_s25  ;;  %p1957_p4 = scmp.ne.s32.totalorder (!%p1673_p8), %s1950_s21, 0 }
  0x65   : > { %1557 = dma.done.wait (%p1957_p4), %s206_s7, 128  }
  0x66   : > { %1559 = vsyncadd (%p1957_p4), %s206_s7, 4294967168  ;;  %p1958_p5 = scmp.eq.s32.totalorder %s1654_s19, 0 }
  0x68   : > { %1561 = dma.done.wait (%p1958_p5), [#allocation6], 1024   ;;  %p1959_p8 = pmov %p1958_p5 }
  0x69   : > { %v1589_v0 = vmov 0.0|0.0   ;;  %vm1590_vm0 = vmmov 0   ;;  %v1591_v1 = vmov 0.0   ;;  %v243_v2 = vld [vmem:[#allocation5] sm:$0xff]  ;;  %v244_v3 = vld [vmem:[#allocation5 + $0x8] sm:$0xff]  ;;  %v245_v4 = vld [vmem:[#allocation5 + $0x10] sm:$0xff]  ;;  %v321_v19 = vlaneseq }
  0x6a   : > { %1563 = vsyncadd (%p1959_p8), [#allocation6], 4294966272  ;;  %1311 = vmatprep.subr.bf16.mxu0 %v1589_v0  ;;  %1257 = vmatprep.mubr.msk.f32.mxu0 %vm1590_vm0, %v1591_v1  ;;  %v1312_v5 = vpack.c.bf16 %v244_v3, %v243_v2  ;;  %v246_v6 = vld [vmem:[#allocation5 + $0x18] sm:$0xff]  ;;  %vm247_vm1 = vcmask 261120   ;;  %s1592_s21 = smov 64   ;;  %s1593_s23 = smov 96  }
  0x6b   : > { %1260 = vmatprep.subr.mxu1 %v1591_v1  ;;  %1262 = vmatprep.mubr.msk.f32.mxu1 %vm1590_vm0, %v1591_v1  ;;  %v1315_v7 = vpack.c.bf16 %v246_v6, %v245_v4  ;;  %v242_v8 = vld [vmem:[%s209_s8] sm:$0xff]  ;;  %s1594_s27 = smov 88   ;;  %s1595_s30 = smov 120   ;;  %vm330_vm2 = vcmask 64512   ;;  %v322_v20 = vshrl.u32 %v321_v19, 7  ;;  %v324_v21 = vand.u32 127, %v321_v19 }
  0x6c   : > { %1313 = vmatpush3.bf16.msra.mxu0 %v1312_v5  ;;  %s1596_s5 = smov 80   ;;  %s1597_s6 = smov 112   ;;  %v1600_v22 = vmov -1e+30   ;;  %v1004_v4 = vld [vmem:[#allocation7] sm:$0xff]  ;;  %v1005_v5 = vld [vmem:[#allocation7 + $0x8] sm:$0xff] }
  0x6d   : > { %1314 = vmatprep.subr.bf16.mxu0 %v1589_v0  ;;  %s1598_s26 = smov 72   ;;  %s1599_s10 = smov 104   ;;  %vm325_vm3 = vcmp.le.s32.totalorder %v324_v21, %v322_v20  ;;  %vm1000_vm4 = vcmask 130048   ;;  %vm1002_vm5 = vcmask 195584  }
  0x6e   : > { %v326_v23 = vsel %vm325_vm3, 0.0, %v1600_v22  ;;  %s1601_s24 = smov 56   ;;  %s1602_s20 = smov 40  }
  0x6f   : > { %s1603_s28 = smov 48   ;;  %s1604_s11 = smov 8  }
  0x70   : > { %1316 = vmatpush3.bf16.msra.mxu0 %v1315_v7  ;;  %v1318_v7 = vpack.c.bf16 %v1005_v5, %v1004_v4  ;;  %s1605_s12 = smov 16   ;;  %s1606_s7 = smov 24  }
  0x71   : > { %1280 = vmatprep.subr.mxu0 %v1591_v1  ;;  %p1960_p0 = scmp.ne.s32.totalorder %s1955_s13, 0 }
  0x73   : > { %1258 = vmatmul.mubr.msk.f32.vlgmr.msra.gmra.mrb[0].mxu0 %vm247_vm1, %v242_v8  ;;  %v1006_v8 = vld [vmem:[#allocation7 + $0x10] sm:$0xff] }
  0x74   : > { %1282 = vmatprep.mubr.msk.f32.mxu0 %vm1590_vm0, %v1591_v1 }
 0x146   : > { %v1827_v9 = vpop.f32.mrb[0].mxu0 }
 0x147   : > { %414 = vrot.lane.b32.xlu1 %v1827_v9, %s1592_s21  ;;  %328 = vrot.lane.b32.xlu0 %v1827_v9, %s1593_s23  ;;  %v1259_v10 = vpop.f32.mrb[1].mxu0  ;;  %s1220_s23 = sshll.u32 %s1654_s19, 7 }
 0x14b   : > { %494 = vrot.lane.b32.xlu1 %v1827_v9, %s1594_s27  ;;  %s241_s27 = scalar_lea.vmem [#allocation8], %s1200_s25  ;;  %s1607_s25 = smov [#allocation8]  }
 0x14f   : > { %492 = vrot.lane.b32.xlu1 %v1827_v9, %s1595_s30  ;;  %s1103_s30 = sshll.u32 %s241_s27, 4  ;;  %s1899_s30 = int_to_ptr.vmem [resolvable:$true] %s1103_s30 }
 0x150   : > { %s1512_s19 = scalar_lea.vmem %s1899_s30, 128 }
 0x151   : > { %p1513_p11 = scmp.ne.s32.totalorder %s1899_s30, %s1512_s19 }
 0x153   : > { %659 = vrot.lane.b32.xlu1 %v1827_v9, %s1596_s5  ;;  %p1514_p1 = pnand %p1513_p11, %p1960_p0 }
 0x155   : > { %p1515_p3 = pneg %p1514_p1 }
 0x157   : > { %657 = vrot.lane.b32.xlu1 %v1827_v9, %s1597_s6 }
 0x15b   : > { %824 = vrot.lane.b32.xlu1 %v1827_v9, %s1598_s26  ;;  %s1897_s26 = scalar_lea.hbm %s1946_s4, %s1220_s23 }
 0x15f   : > { %822 = vrot.lane.b32.xlu1 %v1827_v9, %s1599_s10  ;;  %s1090_s10 = scalar_lea.sflag [#allocation4], %s1802_s29 }
 0x1b9   : > { %v415_v11 = vpop.permute.xlu1 %414  ;;  %v329_v12 = vpop.permute.xlu0 %328 }
 0x1ba   : > { %1261 = vmatpush3.xpose.msk.msra.mxu1 %vm330_vm2, %v329_v12 }
 0x1bb   : > { %1265 = vmatprep.subr.mxu1 %v1591_v1 }
 0x1bd   : > { %v495_v13 = vpop.permute.xlu1 %494  ;;  %1263 = vmatmul.mubr.msk.f32.vlgmr.msra.gmra.mrb[0].mxu1 %vm330_vm2, %v1827_v9 }
 0x1be   : > { %1266 = vmatpush3.msra.mxu1 %v415_v11  ;;  %1267 = vmatprep.mubr.msk.f32.mxu1 %vm1590_vm0, %v1591_v1 }
 0x1bf   : > { %1270 = vmatprep.subr.mxu1 %v1591_v1 }
 0x1c1   : > { %v493_v14 = vpop.permute.xlu1 %492 }
 0x1c5   : > { %v660_v15 = vpop.permute.xlu1 %659 }
 0x1c6   : > { %1281 = vmatpush3.xpose.msk.msra.mxu0 %vm330_vm2, %v660_v15 }
 0x1c7   : > { %1290 = vmatprep.subr.mxu0 %v1591_v1 }
 0x1c9   : > { %v658_v16 = vpop.permute.xlu1 %657 }
 0x1ca   : > { %1283 = vmatmul.mubr.msk.f32.vlgmr.msra.gmra.mrb[2].mxu0 %vm330_vm2, %v658_v16 }
 0x1cb   : > { %1292 = vmatprep.mubr.msk.f32.mxu0 %vm1590_vm0, %v1591_v1 }
 0x1cd   : > { %v825_v17 = vpop.permute.xlu1 %824 }
 0x1ce   : > { %1291 = vmatpush3.xpose.msk.msra.mxu0 %vm330_vm2, %v825_v17 }
 0x1cf   : > { %1317 = vmatprep.subr.bf16.mxu0 %v1589_v0 }
 0x1d1   : > { %v823_v18 = vpop.permute.xlu1 %822 }
 0x1d2   : > { %1293 = vmatmul.mubr.msk.f32.vlgmr.msra.gmra.mrb[4].mxu0 %vm330_vm2, %v823_v18 }
 0x1d3   : > { %1308 = vmatprep.mubr.msk.f32.mxu0 %vm1590_vm0, %v1591_v1  ;;  %1319 = vmatpush3.bf16.msra.mxu0 %v1318_v7 }
 0x1d4   : > { %1320 = vmatprep.subr.bf16.mxu0 %v1589_v0 }
 0x290   : > { %v401_v24 = vpop.f32.mrb[0].mxu1 }
 0x291   : > { %v402_v25 = vadd.f32 %v401_v24, %v326_v23  ;;  %v1264_v26 = vpop.f32.mrb[1].mxu1 }
 0x293   : > { %v405_v27 = vsel %vm330_vm2, %v402_v25, -inf }
 0x294   : > { %406 = vmax.xlane.f32.xlu0 %v405_v27 }
 0x29d   : > { %v731_v28 = vpop.f32.mrb[2].mxu0 }
 0x29e   : > { %v1284_v29 = vpop.f32.mrb[3].mxu0  ;;  %v732_v32 = vadd.f32 %v731_v28, %v326_v23 }
 0x2a0   : > { %v735_v34 = vsel %vm330_vm2, %v732_v32, -inf }
 0x2a5   : > { %v896_v30 = vpop.f32.mrb[4].mxu0 }
 0x2a6   : > { %v1294_v31 = vpop.f32.mrb[5].mxu0  ;;  %v897_v33 = vadd.f32 %v896_v30, %v326_v23 }
 0x2a7   : > { %v1217_v31 = vld [vmem:[%s1945_s3] ss:$0 sm:$0xff] }
 0x2a8   : > { %v900_v35 = vsel %vm330_vm2, %v897_v33, -inf }
 0x2aa   : > { %579 = vrot.lane.b32.xlu0 %v1827_v9, %s1601_s24  ;;  %s1516_s24 = sshll.u32 %s1607_s25, 4  ;;  %s1517_s24 = int_to_ptr.vmem [resolvable:$false] %s1516_s24 }
 0x2ab   : > { %p1519_p7 = scmp.lt.s32.totalorder %s1899_s30, %s1517_s24 }
 0x2c9   : > { %736 = vmax.xlane.f32.xlu0 %v735_v34 }
 0x2cd   : > { %901 = vmax.xlane.f32.xlu0 %v900_v35 }
 0x2e3   : > { %909 = vrot.lane.b32.xlu0 %v1827_v9, %s1602_s20  ;;  %s1518_s20 = scalar_lea.vmem %s1517_s24, 256 }
 0x2e4   : > { %p1520_p9 = scmp.lt.s32.totalorder %s1518_s20, %s1512_s19 }
 0x2e6   : > { %p1521_p12 = por %p1520_p9, %p1519_p7 }
 0x2e8   : > { %p1522_p2 = pnand %p1521_p12, %p1515_p3 }
 0x321   : > { %v407_v36 = vpop.xlane.xlu0 %406 }
 0x322   : > { %v408_v37 = vsub.f32 %v402_v25, %v407_v36 }
 0x324   : > { %v409_v38 = vmul.f32 1.442695, %v408_v37 }
 0x325   : > { %v580_v40 = vpop.permute.xlu0 %579 }
 0x326   : > { %1410 = vpow2.f32 %v409_v38 }
 0x330   : > { %v1411_v39 = vpop.eup %1410 }
 0x331   : > { %1268 = vmatmul.mubr.msk.f32.vlgmr.msra.gmra.mrb[2].mxu1 %vm330_vm2, %v1411_v39  ;;  %v411_v2 = vsel %vm330_vm2, %v1411_v39, 0.0 }
 0x332   : > { %1271 = vmatpush3.xpose.msk.msra.mxu1 %vm330_vm2, %v495_v13  ;;  %1272 = vmatprep.mubr.msk.f32.mxu1 %vm1590_vm0, %v1591_v1 }
 0x333   : > { %1275 = vmatprep.subr.mxu1 %v1591_v1 }
 0x335   : > { %1273 = vmatmul.mubr.msk.f32.vlgmr.msra.gmra.mrb[4].mxu1 %vm330_vm2, %v493_v14 }
 0x336   : > { %1276 = vmatpush3.msra.mxu1 %v580_v40  ;;  %1277 = vmatprep.mubr.msk.f32.mxu1 %vm1590_vm0, %v1591_v1 }
 0x337   : > { %1285 = vmatprep.subr.mxu1 %v1591_v1 }
 0x356   : > { %v737_v47 = vpop.xlane.xlu0 %736 }
 0x357   : > { %v738_v48 = vsub.f32 %v732_v32, %v737_v47 }
 0x359   : > { %v739_v49 = vmul.f32 1.442695, %v738_v48 }
 0x35a   : > { %v902_v52 = vpop.xlane.xlu0 %901 }
 0x35b   : > { %1412 = vpow2.f32 %v739_v49  ;;  %v903_v53 = vsub.f32 %v897_v33, %v902_v52 }
 0x35d   : > { %v904_v56 = vmul.f32 1.442695, %v903_v53 }
 0x35e   : > { %v910_v62 = vpop.permute.xlu0 %909 }
 0x365   : > { %v1413_v50 = vpop.eup %1412 }
 0x366   : > { %v741_v51 = vsel %vm330_vm2, %v1413_v50, 0.0 }
 0x404   : > { %v1868_v41 = vpop.f32.mrb[2].mxu1 }
 0x405   : > { %v1269_v42 = vpop.f32.mrb[3].mxu1 }
 0x408   : > { %v566_v43 = vpop.f32.mrb[4].mxu1 }
 0x409   : > { %v567_v44 = vadd.f32 %v566_v43, %v326_v23  ;;  %v1274_v45 = vpop.f32.mrb[5].mxu1 }
 0x40b   : > { %v570_v46 = vsel %vm330_vm2, %v567_v44, -inf }
 0x40c   : > { %571 = vmax.xlane.f32.xlu1 %v570_v46 }
 0x41d   : > { %744 = vrot.lane.b32.xlu1 %v1827_v9, %s1603_s28  ;;  %v1007_v9 = vld [vmem:[#allocation7 + $0x18] sm:$0xff] }
 0x41e   : > { %v1321_v11 = vpack.c.bf16 %v1007_v9, %v1006_v8 }
 0x420   : > { %1322 = vmatpush3.bf16.msra.mxu0 %v1321_v11 }
 0x441   : > { %742 = vadd.xlane.f32.xlu1 %v741_v51 }
 0x499   : > { %v572_v54 = vpop.xlane.xlu1 %571 }
 0x49a   : > { %v573_v55 = vsub.f32 %v567_v44, %v572_v54 }
 0x49c   : > { %v574_v57 = vmul.f32 1.442695, %v573_v55 }
 0x49d   : > { %v745_v59 = vpop.permute.xlu1 %744 }
 0x49e   : > { %1414 = vpow2.f32 %v574_v57 }
 0x49f   : > { %1416 = vpow2.f32 %v904_v56 }
 0x4a8   : > { %v1415_v58 = vpop.eup %1414 }
 0x4a9   : > { %1278 = vmatmul.mubr.msk.f32.vlgmr.msra.gmra.mrb[6].mxu1 %vm330_vm2, %v1415_v58  ;;  %v576_v60 = vsel %vm330_vm2, %v1415_v58, 0.0  ;;  %v1417_v61 = vpop.eup %1416 }
 0x4aa   : > { %1286 = vmatpush3.msra.mxu1 %v745_v59  ;;  %577 = vadd.xlane.f32.xlu0 %v576_v60  ;;  %v906_v63 = vsel %vm330_vm2, %v1417_v61, 0.0 }
 0x4ab   : > { %1287 = vmatprep.mubr.msk.f32.mxu1 %vm1590_vm0, %v1591_v1  ;;  %1295 = vmatprep.subr.mxu1 %v1591_v1 }
 0x4ad   : > { %1288 = vmatmul.mubr.msk.f32.vlgmr.msra.gmra.mrb[8].mxu1 %vm330_vm2, %v1413_v50 }
 0x4ae   : > { %1296 = vmatpush3.msra.mxu1 %v910_v62  ;;  %907 = vadd.xlane.f32.xlu0 %v906_v63 }
 0x4af   : > { %1297 = vmatprep.mubr.msk.f32.mxu1 %vm1590_vm0, %v1591_v1 }
 0x4b1   : > { %1298 = vmatmul.mubr.msk.f32.vlgmr.msra.gmra.mrb[10].mxu1 %vm330_vm2, %v1417_v61 }
 0x4b2   : > { %412 = vadd.xlane.f32.xlu0 %v411_v2 }
 0x4ce   : > { %v743_v6 = vpop.xlane.xlu1 %742 }
 0x537   : > { %v578_v3 = vpop.xlane.xlu0 %577 }
 0x538   : > { %1418 = vrcp.f32 %v578_v3 }
 0x539   : > { %1420 = vrcp.f32 %v743_v6 }
 0x53b   : > { %v908_v10 = vpop.xlane.xlu0 %907 }
 0x53c   : > { %1422 = vrcp.f32 %v908_v10 }
 0x53f   : > { %v413_v22 = vpop.xlane.xlu0 %412 }
 0x540   : > { %1424 = vrcp.f32 %v413_v22 }
 0x542   : > { %v1419_v1 = vpop.eup %1418 }
 0x543   : > { %v1421_v15 = vpop.eup %1420 }
 0x546   : > { %v1423_v19 = vpop.eup %1422 }
 0x54a   : > { %v1425_v23 = vpop.eup %1424 }
 0x54b   : > { %v491_v25 = vmul.f32 %v1425_v23, %v1868_v41 }
 0x57c   : > { %v651_v12 = vpop.f32.mrb[6].mxu1 }
 0x57d   : > { %v656_v13 = vmul.f32 %v1419_v1, %v651_v12  ;;  %v1279_v14 = vpop.f32.mrb[7].mxu1 }
 0x57f   : > { %988 = vrot.lane.b32.xlu0 %v656_v13, %s1604_s11 }
 0x580   : > { %v816_v16 = vpop.f32.mrb[8].mxu1 }
 0x581   : > { %v821_v17 = vmul.f32 %v1421_v15, %v816_v16  ;;  %v1289_v18 = vpop.f32.mrb[9].mxu1 }
 0x583   : > { %992 = vrot.lane.b32.xlu1 %v821_v17, %s1605_s12 }
 0x584   : > { %v981_v0 = vpop.f32.mrb[10].mxu1 }
 0x585   : > { %v986_v20 = vmul.f32 %v1423_v19, %v981_v0  ;;  %v1299_v21 = vpop.f32.mrb[11].mxu1 }
 0x587   : > { %996 = vrot.lane.b32.xlu0 %v986_v20, %s1606_s7 }
 0x5f1   : > { %v989_v24 = vpop.permute.xlu0 %988 }
 0x5f2   : > { %v999_v27 = vsel %vm330_vm2, %v491_v25, %v989_v24 }
 0x5f5   : > { %v993_v26 = vpop.permute.xlu1 %992 }
 0x5f6   : > { %v1001_v28 = vsel %vm1000_vm4, %v999_v27, %v993_v26 }
 0x5f9   : > { %v997_v29 = vpop.permute.xlu0 %996 }
 0x5fa   : > { %v1003_v30 = vsel %vm1002_vm5, %v1001_v28, %v997_v29 }
 0x5fb   : > { %1309 = vmatmul.mubr.msk.f32.vlgmr.msra.gmra.mrb[6].mxu0 %vm247_vm1, %v1003_v30 }
 0x6ce   : > { %v1084_v32 = vpop.f32.mrb[6].mxu0 }
 0x6cf   : > { %v1085_v33 = vadd.f32 %v1217_v31, %v1084_v32  ;;  %v1310_v34 = vpop.f32.mrb[7].mxu0 }
 0x6d1   : > { %1088 = vst.msk [vmem:[%s241_s27] sm:$0xff] %vm247_vm1, %v1085_v33 }
 0x6d2   : > { %1525 = shalt.err (!%p1522_p2)
}
 0x6d3   : > { %s1526_s29 = scalar_lea.hbm %s1897_s26, 128  ;;  %s1530_s12 = scalar_lea.hbm %s1946_s4, 256 }
 0x6d4   : > { %p1527_p13 = scmp.ne.s32.totalorder %s1897_s26, %s1526_s29  ;;  %p1531_p4 = scmp.lt.u32.totalorder %s1897_s26, %s1946_s4 }
 0x6d5   : > { %p1532_p5 = scmp.lt.u32.totalorder %s1530_s12, %s1526_s29  ;;  %p1534_p11 = scmp.lt.u32.totalorder %s1526_s29, %s1897_s26 }
 0x6d6   : > { %p1528_p6 = pnand %p1527_p13, %p1960_p0 }
 0x6d7   : > { %p1533_p8 = por %p1532_p5, %p1531_p4 }
 0x6d8   : > { %p1529_p10 = pneg %p1528_p6 }
 0x6d9   : > { %p1535_p1 = por %p1534_p11, %p1533_p8 }
 0x6db   : > { %p1536_p3 = pnand %p1535_p1, %p1529_p10 }
 0x6dd   : > { %1539 = shalt.err (!%p1536_p3)
}
 0x6de   : > { %1333 = dma.vmem_to_hbm [thread:$0]  (%p1960_p0), %s1899_s30, 128, %s1897_s26, %s1090_s10  }
 0x6df PF: > { %s1115_s21 = sand.u32 1, %s1570_s15   ;;  %p1961_p7 = scmp.ne.s32.totalorder %s1951_s22, 0 }
 0x6e0   : > { %p1962_p9 = scmp.ge.s32.totalorder %s1582_s18, 2  ;;  %s1116_s23 = scalar_lea.sflag [#allocation4], %s1115_s21 }
 0x6e2   : > { %p1347_p12 = pnand %p1962_p9, %p1961_p7 }
 0x6e4   : > { %1565 = dma.done.wait (!%p1347_p12), %s1116_s23, 128  }
 0x6e5   : > { %1567 = vsyncadd (!%p1347_p12), %s1116_s23, 4294967168  ;;  %p18_p2 = scmp.ge.s32.totalorder %s1743_s9, 4   ;;  %s1963_s15 = smov %s1574_s16 }
 0x6e6   : > { %s1964_s16 = smov %s1578_s17  ;;  %s1965_s17 = smov %s1759_s14 }
 0x6e7   : > { %s1966_s18 = smov %s1743_s9  ;;  %20 = sbr.rel (!%p18_p2) target bundleno = 6 (0x6), region = 89 }
 0x6ee   :  { %1121 = vsyncpa [#allocation3], 1 }
 0x6ef   :  { %1123 = vsyncpa [#allocation3 + $0x1], 1 }
 0x6f0   :  { %1124 = vsyncpa [#allocation6], 1 }
 0x6f1   :  { %1125 = vsyncpa [#allocation4], 1 }
 0x6f2   :  { %1127 = vsyncpa [#allocation4 + $0x1], 1 }

// kernel: tpu_custom_call.1
= control target key start
LH: loop header
LB: loop body
LE: loop exit
PB: predicated region body
PF: predicated region fallthrough
CT: control target
= control target key end

     0   :  { %9 = vsyncpa [#allocation3], 0  ;;  %s1942_s0 = inlined_call_operand.hbm [shape: f32[2,8,32], index: 0, kind: input, shape index: {}]   ;;  %s1943_s1 = inlined_call_operand.hbm [shape: f32[32,96], index: 1, kind: input, shape index: {}]   ;;  %s1944_s2 = inlined_call_operand.hbm [shape: f32[32,32], index: 2, kind: input, shape index: {}]   ;;  %s1945_s3 = inlined_call_operand.vmem [shape: f32[1,32], index: 3, kind: input, shape index: {}]   ;;  %s1946_s4 = inlined_call_operand.hbm [shape: f32[2,8,32], index: 4, kind: output, shape index: {}]  }
   0x1   :  { %11 = vsyncpa [#allocation3 + $0x1], 0 }
   0x2   :  { %12 = vsyncpa [#allocation6], 0 }
   0x3   :  { %13 = vsyncpa [#allocation4], 0 }
   0x4   :  { %15 = vsyncpa [#allocation4 + $0x1], 0  ;;  %s1633_s15 = smov 0   ;;  %s1635_s16 = smov 0  }
   0x5   :  { %s1637_s17 = smov 0   ;;  %s1639_s18 = smov 0  }
   0x6 LB: > { %s1654_s19 = sadd.s32 4294967295, %s1582_s18   ;;  %s1192_s20 = sadd.s32 4294967294, %s1582_s18   ;;  %s1582_s18 = sphi %s1639_s18, %s1966_s18   ;;  %s1578_s17 = sphi %s1637_s17, %s1965_s17   ;;  %s1574_s16 = sphi %s1635_s16, %s1964_s16   ;;  %s1570_s15 = sphi %s1633_s15, %s1963_s15  }
   0x7   : > { %p41_p0 = scmp.ne.s32.totalorder %s1574_s16, %s1570_s15  ;;  %p1947_p1 = scmp.eq.s32.totalorder %s1654_s19, 0 }
   0x8   : > { %p134_p3 = scmp.eq.s32.totalorder %s1192_s20, 1  ;;  %p1193_p5 = scmp.ge.s32.totalorder %s1582_s18, 1 }
   0x9   : > { %p1663_p4 = por %p1947_p1, %p41_p0  ;;  %p141_p7 = scmp.lt.s32.totalorder %s1582_s18, 3 }
   0xa   : > { %p1668_p6 = por %p134_p3, %p41_p0  ;;  %s1584_s24 = smov [#allocation5]  }
   0xb   : > { %s1950_s21 = scalar_select %p1663_p4, 1, 0 }
   0xc   : > { %s1951_s22 = scalar_select %p1668_p6, 1, 0 }
   0xd   : > { %p1673_p8 = pnand %p1193_p5, %p141_p7  ;;  %s153_s25 = sshll.u32 %s1584_s24, 4  ;;  %s1677_s25 = int_to_ptr.vmem [resolvable:$true] %s153_s25 }
   0xe   : > { %s1585_s27 = smov [#allocation7]   ;;  %s1426_s5 = scalar_lea.hbm %s1943_s1, 512 }
   0xf   : > { %p1335_p9 = pneg %p1673_p8  ;;  %s166_s28 = sshll.u32 %s1585_s27, 4  ;;  %s1688_s28 = int_to_ptr.vmem [resolvable:$true] %s166_s28 }
  0x10   : > { %p1427_p12 = scmp.ne.s32.totalorder %s1943_s1, %s1426_s5  ;;  %p1433_p5 = scmp.lt.u32.totalorder %s1426_s5, %s1943_s1 }
  0x11   : > { %p1684_p11 = pnand %p1335_p9, %p1947_p1 }
  0x13   : > { %p1428_p13 = pneg %p1684_p11 }
  0x15   : > { %p1429_p0 = pnand %p1428_p13, %p1427_p12 }
  0x17   : > { %p1430_p3 = pneg %p1429_p0 }
  0x19   : > { %p1435_p7 = pnand %p1433_p5, %p1430_p3 }
  0x1b   : > { %1438 = shalt.err (!%p1435_p7)
}
  0x1c   : > { %s1439_s10 = scalar_lea.vmem %s1677_s25, 512  ;;  %p1447_p2 = scmp.lt.s32.totalorder %s1677_s25, %s1677_s25 }
  0x1d   : > { %p1440_p9 = scmp.ne.s32.totalorder %s1677_s25, %s1439_s10  ;;  %p1448_p12 = scmp.lt.s32.totalorder %s1439_s10, %s1439_s10 }
  0x1f   : > { %p1442_p10 = pnand %p1440_p9, %p1428_p13  ;;  %p1449_p0 = por %p1448_p12, %p1447_p2 }
  0x21   : > { %p1443_p1 = pneg %p1442_p10 }
  0x23   : > { %p1450_p6 = pnand %p1449_p0, %p1443_p1 }
  0x25   : > { %1453 = shalt.err (!%p1450_p6)
}
  0x26   : > { %s1586_s11 = smov 128   ;;  %s1587_s12 = smov 8  }
  0x27   : > { %1338 = dma.hbm_to_vmem [thread:$0]  (!%p1684_p11), %s1943_s1, 512, %s1677_s25, [#allocation6], %s1586_s11, %s1586_s11, %s1587_s12  }
  0x28   : > { %s1454_s27 = scalar_lea.hbm %s1944_s2, 512 }
  0x29   : > { %p1455_p2 = scmp.ne.s32.totalorder %s1944_s2, %s1454_s27  ;;  %p1461_p10 = scmp.lt.u32.totalorder %s1454_s27, %s1944_s2 }
  0x2b   : > { %p1457_p1 = pnand %p1455_p2, %p1428_p13 }
  0x2d   : > { %p1458_p6 = pneg %p1457_p1 }
  0x2f   : > { %p1463_p3 = pnand %p1461_p10, %p1458_p6 }
  0x31   : > { %1466 = shalt.err (!%p1463_p3)
}
  0x32   : > { %s1467_s25 = scalar_lea.vmem %s1688_s28, 512  ;;  %p1475_p12 = scmp.lt.s32.totalorder %s1688_s28, %s1688_s28 }
  0x33   : > { %p1468_p5 = scmp.ne.s32.totalorder %s1688_s28, %s1467_s25  ;;  %p1476_p0 = scmp.lt.s32.totalorder %s1467_s25, %s1467_s25 }
  0x35   : > { %p1470_p7 = pnand %p1468_p5, %p1428_p13  ;;  %p1477_p2 = por %p1476_p0, %p1475_p12 }
  0x37   : > { %p1471_p9 = pneg %p1470_p7 }
  0x39   : > { %p1478_p1 = pnand %p1477_p2, %p1471_p9 }
  0x3b   : > { %1481 = shalt.err (!%p1478_p1)
}
  0x3c   : > { %1341 = dma.hbm_to_vmem [thread:$0]  (!%p1684_p11), %s1944_s2, 512, %s1688_s28, [#allocation6], %s1586_s11, %s1586_s11, %s1587_s12  }
  0x3d   : > { %s1743_s9 = sadd.s32 1, %s1582_s18   ;;  %s28_s26 = sadd.s32 1, %s1578_s17 }
  0x3e   : > { %s25_s10 = ssub.s32 %s1582_s18, %s1743_s9  ;;  %p35_p13 = scmp.ne.s32.totalorder %s1578_s17, %s1574_s16 }
  0x3f   : > { %p26_p6 = scmp.eq.s32.totalorder %s25_s10, 0  ;;  %p36_p10 = scmp.eq.s32.totalorder %s1582_s18, 0 }
  0x40   : > { %p1954_p3 = scmp.eq.s32.totalorder %s1654_s19, 1  ;;  %p1352_p7 = scmp.lt.s32.totalorder %s1582_s18, 2 }
  0x41   : > { %s1759_s14 = scalar_select %p26_p6, %s1578_s17, %s28_s26  }
  0x42   : > { %p1753_p5 = por %p1954_p3, %p35_p13  ;;  %p37_p9 = por %p36_p10, %p35_p13 }
  0x43   : > { %s183_s20 = sand.u32 1, %s1578_s17   ;;  %s1198_s28 = sshll.u32 %s1582_s18, 7 }
  0x44   : > { %s1955_s13 = scalar_select %p1753_p5, 1, 0 }
  0x45   : > { %s1197_s24 = sshll.u32 %s183_s20, 3  ;;  %s1766_s27 = scalar_lea.hbm %s1942_s0, %s1198_s28 }
  0x46   : > { %s187_s29 = scalar_lea.vmem [#allocation2], %s1197_s24  ;;  %p1770_p11 = pnand %p1352_p7, %p37_p9 }
  0x47   : > { %s194_s30 = sshll.u32 %s187_s29, 4  ;;  %s184_s6 = scalar_lea.sflag [#allocation3], %s183_s20  ;;  %s1768_s30 = int_to_ptr.vmem [resolvable:$true] %s194_s30 }
  0x48   : > { %s1482_s25 = scalar_lea.hbm %s1766_s27, 128  ;;  %p1484_p0 = pneg %p1770_p11 }
  0x49   : > { %p1483_p12 = scmp.ne.s32.totalorder %s1766_s27, %s1482_s25  ;;  %s1487_s26 = scalar_lea.hbm %s1942_s0, 256 }
  0x4a   : > { %p1488_p13 = scmp.lt.u32.totalorder %s1766_s27, %s1942_s0  ;;  %p1489_p6 = scmp.lt.u32.totalorder %s1487_s26, %s1482_s25 }
  0x4b   : > { %p1485_p2 = pnand %p1484_p0, %p1483_p12  ;;  %p1491_p3 = scmp.lt.u32.totalorder %s1482_s25, %s1766_s27 }
  0x4c   : > { %p1490_p10 = por %p1489_p6, %p1488_p13 }
  0x4d   : > { %p1486_p1 = pneg %p1485_p2 }
  0x4e   : > { %p1492_p7 = por %p1491_p3, %p1490_p10 }
  0x50   : > { %p1493_p9 = pnand %p1492_p7, %p1486_p1 }
  0x52   : > { %1496 = shalt.err (!%p1493_p9)
}
  0x53   : > { %s1497_s20 = scalar_lea.vmem %s1768_s30, 128  ;;  %s1588_s28 = smov [#allocation2]  }
  0x54   : > { %p1498_p12 = scmp.ne.s32.totalorder %s1768_s30, %s1497_s20  ;;  %s1502_s11 = sshll.u32 %s1588_s28, 4  ;;  %s1503_s11 = int_to_ptr.vmem [resolvable:$false] %s1502_s11 }
  0x55   : > { %s1504_s12 = scalar_lea.vmem %s1503_s11, 256  ;;  %p1505_p4 = scmp.lt.s32.totalorder %s1768_s30, %s1503_s11 }
  0x56   : > { %p1500_p2 = pnand %p1498_p12, %p1484_p0  ;;  %p1506_p13 = scmp.lt.s32.totalorder %s1504_s12, %s1497_s20 }
  0x58   : > { %p1501_p5 = pneg %p1500_p2  ;;  %p1507_p6 = por %p1506_p13, %p1505_p4 }
  0x5a   : > { %p1508_p10 = pnand %p1507_p6, %p1501_p5 }
  0x5c   : > { %1511 = shalt.err (!%p1508_p10)
}
  0x5d   : > { %1345 = dma.hbm_to_vmem [thread:$0]  (!%p1770_p11), %s1766_s27, 128, %s1768_s30, %s184_s6  }
  0x5e   : > { %203 = sbr.rel (%p1673_p8) target bundleno = 1759 (0x6df), region = 36  ;;  %s1802_s29 = sand.u32 (!%p1673_p8), 1, %s1574_s16  }
  0x5f   : > { %s1200_s25 = sshll.u32 (!%p1673_p8), %s1802_s29, 3  ;;  %s206_s7 = scalar_lea.sflag (!%p1673_p8), [#allocation3], %s1802_s29 }
  0x60   : > { %s209_s8 = scalar_lea.vmem (!%p1673_p8), [#allocation2], %s1200_s25  ;;  %p1957_p4 = scmp.ne.s32.totalorder (!%p1673_p8), %s1950_s21, 0 }
  0x65   : > { %1557 = dma.done.wait (%p1957_p4), %s206_s7, 128  }
  0x66   : > { %1559 = vsyncadd (%p1957_p4), %s206_s7, 4294967168  ;;  %p1958_p5 = scmp.eq.s32.totalorder %s1654_s19, 0 }
  0x68   : > { %1561 = dma.done.wait (%p1958_p5), [#allocation6], 1024   ;;  %p1959_p8 = pmov %p1958_p5 }
  0x69   : > { %v1589_v0 = vmov 0.0|0.0   ;;  %vm1590_vm0 = vmmov 0   ;;  %v1591_v1 = vmov 0.0   ;;  %v243_v2 = vld [vmem:[#allocation5] sm:$0xff]  ;;  %v244_v3 = vld [vmem:[#allocation5 + $0x8] sm:$0xff]  ;;  %v245_v4 = vld [vmem:[#allocation5 + $0x10] sm:$0xff]  ;;  %v321_v19 = vlaneseq }
  0x6a   : > { %1563 = vsyncadd (%p1959_p8), [#allocation6], 4294966272  ;;  %1311 = vmatprep.subr.bf16.mxu0 %v1589_v0  ;;  %1257 = vmatprep.mubr.msk.f32.mxu0 %vm1590_vm0, %v1591_v1  ;;  %v1312_v5 = vpack.c.bf16 %v244_v3, %v243_v2  ;;  %v246_v6 = vld [vmem:[#allocation5 + $0x18] sm:$0xff]  ;;  %vm247_vm1 = vcmask 261120   ;;  %s1592_s21 = smov 64   ;;  %s1593_s23 = smov 96  }
  0x6b   : > { %1260 = vmatprep.subr.mxu1 %v1591_v1  ;;  %1262 = vmatprep.mubr.msk.f32.mxu1 %vm1590_vm0, %v1591_v1  ;;  %v1315_v7 = vpack.c.bf16 %v246_v6, %v245_v4  ;;  %v242_v8 = vld [vmem:[%s209_s8] sm:$0xff]  ;;  %s1594_s27 = smov 88   ;;  %s1595_s30 = smov 120   ;;  %vm330_vm2 = vcmask 64512   ;;  %v322_v20 = vshrl.u32 %v321_v19, 7  ;;  %v324_v21 = vand.u32 127, %v321_v19 }
  0x6c   : > { %1313 = vmatpush3.bf16.msra.mxu0 %v1312_v5  ;;  %s1596_s5 = smov 80   ;;  %s1597_s6 = smov 112   ;;  %v1600_v22 = vmov -1e+30   ;;  %v1004_v4 = vld [vmem:[#allocation7] sm:$0xff]  ;;  %v1005_v5 = vld [vmem:[#allocation7 + $0x8] sm:$0xff] }
  0x6d   : > { %1314 = vmatprep.subr.bf16.mxu0 %v1589_v0  ;;  %s1598_s26 = smov 72   ;;  %s1599_s10 = smov 104   ;;  %vm325_vm3 = vcmp.le.s32.totalorder %v324_v21, %v322_v20  ;;  %vm1000_vm4 = vcmask 130048   ;;  %vm1002_vm5 = vcmask 195584  }
  0x6e   : > { %v326_v23 = vsel %vm325_vm3, 0.0, %v1600_v22  ;;  %s1601_s24 = smov 56   ;;  %s1602_s20 = smov 40  }
  0x6f   : > { %s1603_s28 = smov 48   ;;  %s1604_s11 = smov 8  }
  0x70   : > { %1316 = vmatpush3.bf16.msra.mxu0 %v1315_v7  ;;  %v1318_v7 = vpack.c.bf16 %v1005_v5, %v1004_v4  ;;  %s1605_s12 = smov 16   ;;  %s1606_s7 = smov 24  }
  0x71   : > { %1280 = vmatprep.subr.mxu0 %v1591_v1  ;;  %p1960_p0 = scmp.ne.s32.totalorder %s1955_s13, 0 }
  0x73   : > { %1258 = vmatmul.mubr.msk.f32.vlgmr.msra.gmra.mrb[0].mxu0 %vm247_vm1, %v242_v8  ;;  %v1006_v8 = vld [vmem:[#allocation7 + $0x10] sm:$0xff] }
  0x74   : > { %1282 = vmatprep.mubr.msk.f32.mxu0 %vm1590_vm0, %v1591_v1 }
 0x146   : > { %v1827_v9 = vpop.f32.mrb[0].mxu0 }
 0x147   : > { %414 = vrot.lane.b32.xlu1 %v1827_v9, %s1592_s21  ;;  %328 = vrot.lane.b32.xlu0 %v1827_v9, %s1593_s23  ;;  %v1259_v10 = vpop.f32.mrb[1].mxu0  ;;  %s1220_s23 = sshll.u32 %s1654_s19, 7 }
 0x14b   : > { %494 = vrot.lane.b32.xlu1 %v1827_v9, %s1594_s27  ;;  %s241_s27 = scalar_lea.vmem [#allocation8], %s1200_s25  ;;  %s1607_s25 = smov [#allocation8]  }
 0x14f   : > { %492 = vrot.lane.b32.xlu1 %v1827_v9, %s1595_s30  ;;  %s1103_s30 = sshll.u32 %s241_s27, 4  ;;  %s1899_s30 = int_to_ptr.vmem [resolvable:$true] %s1103_s30 }
 0x150   : > { %s1512_s19 = scalar_lea.vmem %s1899_s30, 128 }
 0x151   : > { %p1513_p11 = scmp.ne.s32.totalorder %s1899_s30, %s1512_s19 }
 0x153   : > { %659 = vrot.lane.b32.xlu1 %v1827_v9, %s1596_s5  ;;  %p1514_p1 = pnand %p1513_p11, %p1960_p0 }
 0x155   : > { %p1515_p3 = pneg %p1514_p1 }
 0x157   : > { %657 = vrot.lane.b32.xlu1 %v1827_v9, %s1597_s6 }
 0x15b   : > { %824 = vrot.lane.b32.xlu1 %v1827_v9, %s1598_s26  ;;  %s1897_s26 = scalar_lea.hbm %s1946_s4, %s1220_s23 }
 0x15f   : > { %822 = vrot.lane.b32.xlu1 %v1827_v9, %s1599_s10  ;;  %s1090_s10 = scalar_lea.sflag [#allocation4], %s1802_s29 }
 0x1b9   : > { %v415_v11 = vpop.permute.xlu1 %414  ;;  %v329_v12 = vpop.permute.xlu0 %328 }
 0x1ba   : > { %1261 = vmatpush3.xpose.msk.msra.mxu1 %vm330_vm2, %v329_v12 }
 0x1bb   : > { %1265 = vmatprep.subr.mxu1 %v1591_v1 }
 0x1bd   : > { %v495_v13 = vpop.permute.xlu1 %494  ;;  %1263 = vmatmul.mubr.msk.f32.vlgmr.msra.gmra.mrb[0].mxu1 %vm330_vm2, %v1827_v9 }
 0x1be   : > { %1266 = vmatpush3.msra.mxu1 %v415_v11  ;;  %1267 = vmatprep.mubr.msk.f32.mxu1 %vm1590_vm0, %v1591_v1 }
 0x1bf   : > { %1270 = vmatprep.subr.mxu1 %v1591_v1 }
 0x1c1   : > { %v493_v14 = vpop.permute.xlu1 %492 }
 0x1c5   : > { %v660_v15 = vpop.permute.xlu1 %659 }
 0x1c6   : > { %1281 = vmatpush3.xpose.msk.msra.mxu0 %vm330_vm2, %v660_v15 }
 0x1c7   : > { %1290 = vmatprep.subr.mxu0 %v1591_v1 }
 0x1c9   : > { %v658_v16 = vpop.permute.xlu1 %657 }
 0x1ca   : > { %1283 = vmatmul.mubr.msk.f32.vlgmr.msra.gmra.mrb[2].mxu0 %vm330_vm2, %v658_v16 }
 0x1cb   : > { %1292 = vmatprep.mubr.msk.f32.mxu0 %vm1590_vm0, %v1591_v1 }
 0x1cd   : > { %v825_v17 = vpop.permute.xlu1 %824 }
 0x1ce   : > { %1291 = vmatpush3.xpose.msk.msra.mxu0 %vm330_vm2, %v825_v17 }
 0x1cf   : > { %1317 = vmatprep.subr.bf16.mxu0 %v1589_v0 }
 0x1d1   : > { %v823_v18 = vpop.permute.xlu1 %822 }
 0x1d2   : > { %1293 = vmatmul.mubr.msk.f32.vlgmr.msra.gmra.mrb[4].mxu0 %vm330_vm2, %v823_v18 }
 0x1d3   : > { %1308 = vmatprep.mubr.msk.f32.mxu0 %vm1590_vm0, %v1591_v1  ;;  %1319 = vmatpush3.bf16.msra.mxu0 %v1318_v7 }
 0x1d4   : > { %1320 = vmatprep.subr.bf16.mxu0 %v1589_v0 }
 0x290   : > { %v401_v24 = vpop.f32.mrb[0].mxu1 }
 0x291   : > { %v402_v25 = vadd.f32 %v401_v24, %v326_v23  ;;  %v1264_v26 = vpop.f32.mrb[1].mxu1 }
 0x293   : > { %v405_v27 = vsel %vm330_vm2, %v402_v25, -inf }
 0x294   : > { %406 = vmax.xlane.f32.xlu0 %v405_v27 }
 0x29d   : > { %v731_v28 = vpop.f32.mrb[2].mxu0 }
 0x29e   : > { %v1284_v29 = vpop.f32.mrb[3].mxu0  ;;  %v732_v32 = vadd.f32 %v731_v28, %v326_v23 }
 0x2a0   : > { %v735_v34 = vsel %vm330_vm2, %v732_v32, -inf }
 0x2a5   : > { %v896_v30 = vpop.f32.mrb[4].mxu0 }
 0x2a6   : > { %v1294_v31 = vpop.f32.mrb[5].mxu0  ;;  %v897_v33 = vadd.f32 %v896_v30, %v326_v23 }
 0x2a7   : > { %v1217_v31 = vld [vmem:[%s1945_s3] ss:$0 sm:$0xff] }
 0x2a8   : > { %v900_v35 = vsel %vm330_vm2, %v897_v33, -inf }
 0x2aa   : > { %579 = vrot.lane.b32.xlu0 %v1827_v9, %s1601_s24  ;;  %s1516_s24 = sshll.u32 %s1607_s25, 4  ;;  %s1517_s24 = int_to_ptr.vmem [resolvable:$false] %s1516_s24 }
 0x2ab   : > { %p1519_p7 = scmp.lt.s32.totalorder %s1899_s30, %s1517_s24 }
 0x2c9   : > { %736 = vmax.xlane.f32.xlu0 %v735_v34 }
 0x2cd   : > { %901 = vmax.xlane.f32.xlu0 %v900_v35 }
 0x2e3   : > { %909 = vrot.lane.b32.xlu0 %v1827_v9, %s1602_s20  ;;  %s1518_s20 = scalar_lea.vmem %s1517_s24, 256 }
 0x2e4   : > { %p1520_p9 = scmp.lt.s32.totalorder %s1518_s20, %s1512_s19 }
 0x2e6   : > { %p1521_p12 = por %p1520_p9, %p1519_p7 }
 0x2e8   : > { %p1522_p2 = pnand %p1521_p12, %p1515_p3 }
 0x321   : > { %v407_v36 = vpop.xlane.xlu0 %406 }
 0x322   : > { %v408_v37 = vsub.f32 %v402_v25, %v407_v36 }
 0x324   : > { %v409_v38 = vmul.f32 1.442695, %v408_v37 }
 0x325   : > { %v580_v40 = vpop.permute.xlu0 %579 }
 0x326   : > { %1410 = vpow2.f32 %v409_v38 }
 0x330   : > { %v1411_v39 = vpop.eup %1410 }
 0x331   : > { %1268 = vmatmul.mubr.msk.f32.vlgmr.msra.gmra.mrb[2].mxu1 %vm330_vm2, %v1411_v39  ;;  %v411_v2 = vsel %vm330_vm2, %v1411_v39, 0.0 }
 0x332   : > { %1271 = vmatpush3.xpose.msk.msra.mxu1 %vm330_vm2, %v495_v13  ;;  %1272 = vmatprep.mubr.msk.f32.mxu1 %vm1590_vm0, %v1591_v1 }
 0x333   : > { %1275 = vmatprep.subr.mxu1 %v1591_v1 }
 0x335   : > { %1273 = vmatmul.mubr.msk.f32.vlgmr.msra.gmra.mrb[4].mxu1 %vm330_vm2, %v493_v14 }
 0x336   : > { %1276 = vmatpush3.msra.mxu1 %v580_v40  ;;  %1277 = vmatprep.mubr.msk.f32.mxu1 %vm1590_vm0, %v1591_v1 }
 0x337   : > { %1285 = vmatprep.subr.mxu1 %v1591_v1 }
 0x356   : > { %v737_v47 = vpop.xlane.xlu0 %736 }
 0x357   : > { %v738_v48 = vsub.f32 %v732_v32, %v737_v47 }
 0x359   : > { %v739_v49 = vmul.f32 1.442695, %v738_v48 }
 0x35a   : > { %v902_v52 = vpop.xlane.xlu0 %901 }
 0x35b   : > { %1412 = vpow2.f32 %v739_v49  ;;  %v903_v53 = vsub.f32 %v897_v33, %v902_v52 }
 0x35d   : > { %v904_v56 = vmul.f32 1.442695, %v903_v53 }
 0x35e   : > { %v910_v62 = vpop.permute.xlu0 %909 }
 0x365   : > { %v1413_v50 = vpop.eup %1412 }
 0x366   : > { %v741_v51 = vsel %vm330_vm2, %v1413_v50, 0.0 }
 0x404   : > { %v1868_v41 = vpop.f32.mrb[2].mxu1 }
 0x405   : > { %v1269_v42 = vpop.f32.mrb[3].mxu1 }
 0x408   : > { %v566_v43 = vpop.f32.mrb[4].mxu1 }
 0x409   : > { %v567_v44 = vadd.f32 %v566_v43, %v326_v23  ;;  %v1274_v45 = vpop.f32.mrb[5].mxu1 }
 0x40b   : > { %v570_v46 = vsel %vm330_vm2, %v567_v44, -inf }
 0x40c   : > { %571 = vmax.xlane.f32.xlu1 %v570_v46 }
 0x41d   : > { %744 = vrot.lane.b32.xlu1 %v1827_v9, %s1603_s28  ;;  %v1007_v9 = vld [vmem:[#allocation7 + $0x18] sm:$0xff] }
 0x41e   : > { %v1321_v11 = vpack.c.bf16 %v1007_v9, %v1006_v8 }
 0x420   : > { %1322 = vmatpush3.bf16.msra.mxu0 %v1321_v11 }
 0x441   : > { %742 = vadd.xlane.f32.xlu1 %v741_v51 }
 0x499   : > { %v572_v54 = vpop.xlane.xlu1 %571 }
 0x49a   : > { %v573_v55 = vsub.f32 %v567_v44, %v572_v54 }
 0x49c   : > { %v574_v57 = vmul.f32 1.442695, %v573_v55 }
 0x49d   : > { %v745_v59 = vpop.permute.xlu1 %744 }
 0x49e   : > { %1414 = vpow2.f32 %v574_v57 }
 0x49f   : > { %1416 = vpow2.f32 %v904_v56 }
 0x4a8   : > { %v1415_v58 = vpop.eup %1414 }
 0x4a9   : > { %1278 = vmatmul.mubr.msk.f32.vlgmr.msra.gmra.mrb[6].mxu1 %vm330_vm2, %v1415_v58  ;;  %v576_v60 = vsel %vm330_vm2, %v1415_v58, 0.0  ;;  %v1417_v61 = vpop.eup %1416 }
 0x4aa   : > { %1286 = vmatpush3.msra.mxu1 %v745_v59  ;;  %577 = vadd.xlane.f32.xlu0 %v576_v60  ;;  %v906_v63 = vsel %vm330_vm2, %v1417_v61, 0.0 }
 0x4ab   : > { %1287 = vmatprep.mubr.msk.f32.mxu1 %vm1590_vm0, %v1591_v1  ;;  %1295 = vmatprep.subr.mxu1 %v1591_v1 }
 0x4ad   : > { %1288 = vmatmul.mubr.msk.f32.vlgmr.msra.gmra.mrb[8].mxu1 %vm330_vm2, %v1413_v50 }
 0x4ae   : > { %1296 = vmatpush3.msra.mxu1 %v910_v62  ;;  %907 = vadd.xlane.f32.xlu0 %v906_v63 }
 0x4af   : > { %1297 = vmatprep.mubr.msk.f32.mxu1 %vm1590_vm0, %v1591_v1 }
 0x4b1   : > { %1298 = vmatmul.mubr.msk.f32.vlgmr.msra.gmra.mrb[10].mxu1 %vm330_vm2, %v1417_v61 }
 0x4b2   : > { %412 = vadd.xlane.f32.xlu0 %v411_v2 }
 0x4ce   : > { %v743_v6 = vpop.xlane.xlu1 %742 }
 0x537   : > { %v578_v3 = vpop.xlane.xlu0 %577 }
 0x538   : > { %1418 = vrcp.f32 %v578_v3 }
 0x539   : > { %1420 = vrcp.f32 %v743_v6 }
 0x53b   : > { %v908_v10 = vpop.xlane.xlu0 %907 }
 0x53c   : > { %1422 = vrcp.f32 %v908_v10 }
 0x53f   : > { %v413_v22 = vpop.xlane.xlu0 %412 }
 0x540   : > { %1424 = vrcp.f32 %v413_v22 }
 0x542   : > { %v1419_v1 = vpop.eup %1418 }
 0x543   : > { %v1421_v15 = vpop.eup %1420 }
 0x546   : > { %v1423_v19 = vpop.eup %1422 }
 0x54a   : > { %v1425_v23 = vpop.eup %1424 }
 0x54b   : > { %v491_v25 = vmul.f32 %v1425_v23, %v1868_v41 }
 0x57c   : > { %v651_v12 = vpop.f32.mrb[6].mxu1 }
 0x57d   : > { %v656_v13 = vmul.f32 %v1419_v1, %v651_v12  ;;  %v1279_v14 = vpop.f32.mrb[7].mxu1 }
 0x57f   : > { %988 = vrot.lane.b32.xlu0 %v656_v13, %s1604_s11 }
 0x580   : > { %v816_v16 = vpop.f32.mrb[8].mxu1 }
 0x581   : > { %v821_v17 = vmul.f32 %v1421_v15, %v816_v16  ;;  %v1289_v18 = vpop.f32.mrb[9].mxu1 }
 0x583   : > { %992 = vrot.lane.b32.xlu1 %v821_v17, %s1605_s12 }
 0x584   : > { %v981_v0 = vpop.f32.mrb[10].mxu1 }
 0x585   : > { %v986_v20 = vmul.f32 %v1423_v19, %v981_v0  ;;  %v1299_v21 = vpop.f32.mrb[11].mxu1 }
 0x587   : > { %996 = vrot.lane.b32.xlu0 %v986_v20, %s1606_s7 }
 0x5f1   : > { %v989_v24 = vpop.permute.xlu0 %988 }
 0x5f2   : > { %v999_v27 = vsel %vm330_vm2, %v491_v25, %v989_v24 }
 0x5f5   : > { %v993_v26 = vpop.permute.xlu1 %992 }
 0x5f6   : > { %v1001_v28 = vsel %vm1000_vm4, %v999_v27, %v993_v26 }
 0x5f9   : > { %v997_v29 = vpop.permute.xlu0 %996 }
 0x5fa   : > { %v1003_v30 = vsel %vm1002_vm5, %v1001_v28, %v997_v29 }
 0x5fb   : > { %1309 = vmatmul.mubr.msk.f32.vlgmr.msra.gmra.mrb[6].mxu0 %vm247_vm1, %v1003_v30 }
 0x6ce   : > { %v1084_v32 = vpop.f32.mrb[6].mxu0 }
 0x6cf   : > { %v1085_v33 = vadd.f32 %v1217_v31, %v1084_v32  ;;  %v1310_v34 = vpop.f32.mrb[7].mxu0 }
 0x6d1   : > { %1088 = vst.msk [vmem:[%s241_s27] sm:$0xff] %vm247_vm1, %v1085_v33 }
 0x6d2   : > { %1525 = shalt.err (!%p1522_p2)
}
 0x6d3   : > { %s1526_s29 = scalar_lea.hbm %s1897_s26, 128  ;;  %s1530_s12 = scalar_lea.hbm %s1946_s4, 256 }
 0x6d4   : > { %p1527_p13 = scmp.ne.s32.totalorder %s1897_s26, %s1526_s29  ;;  %p1531_p4 = scmp.lt.u32.totalorder %s1897_s26, %s1946_s4 }
 0x6d5   : > { %p1532_p5 = scmp.lt.u32.totalorder %s1530_s12, %s1526_s29  ;;  %p1534_p11 = scmp.lt.u32.totalorder %s1526_s29, %s1897_s26 }
 0x6d6   : > { %p1528_p6 = pnand %p1527_p13, %p1960_p0 }
 0x6d7   : > { %p1533_p8 = por %p1532_p5, %p1531_p4 }
 0x6d8   : > { %p1529_p10 = pneg %p1528_p6 }
 0x6d9   : > { %p1535_p1 = por %p1534_p11, %p1533_p8 }
 0x6db   : > { %p1536_p3 = pnand %p1535_p1, %p1529_p10 }
 0x6dd   : > { %1539 = shalt.err (!%p1536_p3)
}
 0x6de   : > { %1333 = dma.vmem_to_hbm [thread:$0]  (%p1960_p0), %s1899_s30, 128, %s1897_s26, %s1090_s10  }
 0x6df PF: > { %s1115_s21 = sand.u32 1, %s1570_s15   ;;  %p1961_p7 = scmp.ne.s32.totalorder %s1951_s22, 0 }
 0x6e0   : > { %p1962_p9 = scmp.ge.s32.totalorder %s1582_s18, 2  ;;  %s1116_s23 = scalar_lea.sflag [#allocation4], %s1115_s21 }
 0x6e2   : > { %p1347_p12 = pnand %p1962_p9, %p1961_p7 }
 0x6e4   : > { %1565 = dma.done.wait (!%p1347_p12), %s1116_s23, 128  }
 0x6e5   : > { %1567 = vsyncadd (!%p1347_p12), %s1116_s23, 4294967168  ;;  %p18_p2 = scmp.ge.s32.totalorder %s1743_s9, 4   ;;  %s1963_s15 = smov %s1574_s16 }
 0x6e6   : > { %s1964_s16 = smov %s1578_s17  ;;  %s1965_s17 = smov %s1759_s14 }
 0x6e7   : > { %s1966_s18 = smov %s1743_s9  ;;  %20 = sbr.rel (!%p18_p2) target bundleno = 6 (0x6), region = 89 }
 0x6ee   :  { %1121 = vsyncpa [#allocation3], 1 }
 0x6ef   :  { %1123 = vsyncpa [#allocation3 + $0x1], 1 }
 0x6f0   :  { %1124 = vsyncpa [#allocation6], 1 }
 0x6f1   :  { %1125 = vsyncpa [#allocation4], 1 }
 0x6f2   :  { %1127 = vsyncpa [#allocation4 + $0x1], 1 }

</bundles_post_ra>
